<compile_context>
chip_gen: v5e
topology: v5e:2x2
jax: 0.10.0
libtpu: 0.0.40
codegen_flags: <defaults>
</compile_context>

<pallas_src>
import functools

import jax
import jax.numpy as jnp
from jax.experimental import pallas as pl
from jax.experimental.pallas import tpu as pltpu

_VMEM_LIMIT_BYTES = 32 * 1024 * 1024   # < v7x 64 MiB physical; raises v5e default


# ----------------------------------------------------------------------------
# Pallas kernels
# ----------------------------------------------------------------------------
def _conv3x3_bn_relu_kernel(xb_ref, xt_ref, xbt_ref, w_ref, b_ref, o_ref,
                            xs_ref, *, stride, S_out, W, Wo, Cin, Cout,
                            n_strips):
    """3x3 conv (any stride, pad=1) + folded BN + ReLU on one row strip.

    xb_ref : (1, S_in, W, Cin)    bf16  strip of the input (S_in = S_out*stride)
    xt_ref : (1, 1, W, Cin)       bf16  row above the strip (clamped index_map)
    xbt_ref: (1, 1, W, Cin)       bf16  row below the strip (clamped index_map)
    w_ref  : (9*Cin, Cout)        bf16  BN-folded weights, row = (kh*3+kw)*Cin+c
    b_ref  : (1, Cout)            f32   folded BN bias
    o_ref  : (1, S_out, Wo, Cout) bf16
    xs_ref : (S_in+2, W+2, Cin)   bf16  zero-padded staging scratch
    """
    s = pl.program_id(1)
    S_in = S_out * stride
    zrow = jnp.zeros((1, W, Cin), jnp.bfloat16)

    # ---- stage the zero-padded strip (halo rows gated with pl.when) ----
    xs_ref[1:S_in + 1, 1:W + 1, :] = xb_ref[0]

    @pl.when(s > 0)
    def _():
        xs_ref[0:1, 1:W + 1, :] = xt_ref[0]

    @pl.when(s == 0)
    def _():
        xs_ref[0:1, 1:W + 1, :] = zrow

    @pl.when(s < n_strips - 1)
    def _():
        xs_ref[S_in + 1:S_in + 2, 1:W + 1, :] = xbt_ref[0]

    @pl.when(s == n_strips - 1)
    def _():
        xs_ref[S_in + 1:S_in + 2, 1:W + 1, :] = zrow

    zcol = jnp.zeros((S_in + 2, 1, Cin), jnp.bfloat16)
    xs_ref[:, 0:1, :] = zcol
    xs_ref[:, W + 1:W + 2, :] = zcol

    # ---- im2col: one MXU dot, contraction K = 9*Cin, f32 accumulation ----
    M = S_out * Wo
    taps = []
    for kh in range(3):
        for kw in range(3):
            if stride == 1:
                win = xs_ref[kh:kh + S_out, kw:kw + Wo, :]
            else:
                win = xs_ref[pl.ds(kh, S_out, stride), pl.ds(kw, Wo, stride), :]
            taps.append(win.reshape(M, Cin))
    lhs = jnp.concatenate(taps, axis=-1)                      # (M, 9*Cin) bf16
    y = jnp.dot(lhs, w_ref[...], preferred_element_type=jnp.float32)
    y = jnp.maximum(y + b_ref[...], 0.0)
    o_ref[0] = y.reshape(S_out, Wo, Cout).astype(o_ref.dtype)


def _conv3x3_bn_add_relu_kernel(yb_ref, yt_ref, ybt_ref, w_ref, b_ref, *rest,
                                S_out, Wo, Cin, Cout, n_strips, shortcut_conv):
    """3x3 conv (stride 1, pad=1) + folded BN + fused shortcut + add + ReLU.

    shortcut_conv=True : rest = (resid, wsc, bsc, out, scratch); resid is the
                         already spatially-decimated input strip; the 1x1-conv
                         + BN shortcut is computed in-kernel.
    shortcut_conv=False: rest = (resid, out, scratch); identity shortcut.
    """
    if shortcut_conv:
        r_ref, wsc_ref, bsc_ref, o_ref, ys_ref = rest
    else:
        r_ref, o_ref, ys_ref = rest

    s = pl.program_id(1)
    zrow = jnp.zeros((1, Wo, Cout), jnp.bfloat16)

    # ---- stage the zero-padded y1 strip ----
    ys_ref[1:S_out + 1, 1:Wo + 1, :] = yb_ref[0]

    @pl.when(s > 0)
    def _():
        ys_ref[0:1, 1:Wo + 1, :] = yt_ref[0]

    @pl.when(s == 0)
    def _():
        ys_ref[0:1, 1:Wo + 1, :] = zrow

    @pl.when(s < n_strips - 1)
    def _():
        ys_ref[S_out + 1:S_out + 2, 1:Wo + 1, :] = ybt_ref[0]

    @pl.when(s == n_strips - 1)
    def _():
        ys_ref[S_out + 1:S_out + 2, 1:Wo + 1, :] = zrow

    zcol = jnp.zeros((S_out + 2, 1, Cout), jnp.bfloat16)
    ys_ref[:, 0:1, :] = zcol
    ys_ref[:, Wo + 1:Wo + 2, :] = zcol

    # ---- im2col single dot (K = 9*Cout) ----
    M = S_out * Wo
    taps = []
    for kh in range(3):
        for kw in range(3):
            taps.append(ys_ref[kh:kh + S_out, kw:kw + Wo, :].reshape(M, Cout))
    lhs = jnp.concatenate(taps, axis=-1)                      # (M, 9*Cout) bf16
    acc = jnp.dot(lhs, w_ref[...], preferred_element_type=jnp.float32)
    acc = acc + b_ref[...]

    # ---- fused shortcut ----
    if shortcut_conv:
        rlhs = r_ref[0].reshape(M, Cin)                       # bf16, pre-decimated
        sc = jnp.dot(rlhs, wsc_ref[...], preferred_element_type=jnp.float32)
        sc = sc + bsc_ref[...]
    else:
        sc = r_ref[0].reshape(M, Cout).astype(jnp.float32)

    out = jnp.maximum(acc + sc, 0.0)
    o_ref[0] = out.reshape(S_out, Wo, Cout).astype(o_ref.dtype)


# ----------------------------------------------------------------------------
# pallas_call wrappers (NHWC, bf16 activations)
# ----------------------------------------------------------------------------
def conv3x3_bn_relu(x, w, b, *, stride, S_out):
    N, H, W, Cin = x.shape
    Cout = w.shape[-1]
    Ho, Wo = H // stride, W // stride
    n_strips = Ho // S_out
    S_in = S_out * stride

    kernel = functools.partial(
        _conv3x3_bn_relu_kernel, stride=stride, S_out=S_out, W=W, Wo=Wo,
        Cin=Cin, Cout=Cout, n_strips=n_strips)

    return pl.pallas_call(
        kernel,
        out_shape=jax.ShapeDtypeStruct((N, Ho, Wo, Cout), jnp.bfloat16),
        grid=(N, n_strips),
        in_specs=[
            pl.BlockSpec((1, S_in, W, Cin), lambda n, s: (n, s, 0, 0)),
            pl.BlockSpec((1, 1, W, Cin),
                         lambda n, s: (n, jnp.maximum(s * S_in - 1, 0), 0, 0)),
            pl.BlockSpec((1, 1, W, Cin),
                         lambda n, s: (n, jnp.minimum((s + 1) * S_in, H - 1), 0, 0)),
            pl.BlockSpec((9 * Cin, Cout), lambda n, s: (0, 0)),
            pl.BlockSpec((1, Cout), lambda n, s: (0, 0)),
        ],
        out_specs=pl.BlockSpec((1, S_out, Wo, Cout), lambda n, s: (n, s, 0, 0)),
        scratch_shapes=[pltpu.VMEM((S_in + 2, W + 2, Cin), jnp.bfloat16)],
        compiler_params=pltpu.CompilerParams(
            dimension_semantics=("parallel", "parallel"),
            vmem_limit_bytes=_VMEM_LIMIT_BYTES),
    )(x, x, x, w, b)


def conv3x3_bn_add_relu(y1, w, b, resid, wsc, bsc, *, S_out):
    N, Ho, Wo, Cout = y1.shape
    n_strips = Ho // S_out
    shortcut_conv = wsc is not None
    Cin = resid.shape[-1]

    kernel = functools.partial(
        _conv3x3_bn_add_relu_kernel, S_out=S_out, Wo=Wo, Cin=Cin, Cout=Cout,
        n_strips=n_strips, shortcut_conv=shortcut_conv)

    in_specs = [
        pl.BlockSpec((1, S_out, Wo, Cout), lambda n, s: (n, s, 0, 0)),
        pl.BlockSpec((1, 1, Wo, Cout),
                     lambda n, s: (n, jnp.maximum(s * S_out - 1, 0), 0, 0)),
        pl.BlockSpec((1, 1, Wo, Cout),
                     lambda n, s: (n, jnp.minimum((s + 1) * S_out, Ho - 1), 0, 0)),
        pl.BlockSpec((9 * Cout, Cout), lambda n, s: (0, 0)),
        pl.BlockSpec((1, Cout), lambda n, s: (0, 0)),
        pl.BlockSpec((1, S_out, Wo, Cin), lambda n, s: (n, s, 0, 0)),
    ]
    args = [y1, y1, y1, w, b, resid]
    if shortcut_conv:
        in_specs += [pl.BlockSpec((Cin, Cout), lambda n, s: (0, 0)),
                     pl.BlockSpec((1, Cout), lambda n, s: (0, 0))]
        args += [wsc, bsc]

    return pl.pallas_call(
        kernel,
        out_shape=jax.ShapeDtypeStruct((N, Ho, Wo, Cout), jnp.bfloat16),
        grid=(N, n_strips),
        in_specs=in_specs,
        out_specs=pl.BlockSpec((1, S_out, Wo, Cout), lambda n, s: (n, s, 0, 0)),
        scratch_shapes=[pltpu.VMEM((S_out + 2, Wo + 2, Cout), jnp.bfloat16)],
        compiler_params=pltpu.CompilerParams(
            dimension_semantics=("parallel", "parallel"),
            vmem_limit_bytes=_VMEM_LIMIT_BYTES),
    )(*args)


# ----------------------------------------------------------------------------
# Parameter init (deterministic) + BN folding / weight prep
# ----------------------------------------------------------------------------
def init_params(key, inchannel, outchannel, stride):
    ks = jax.random.split(key, 8)
    p = {
        # PyTorch conv weight layout: (O, I, kh, kw)
        "w1": jax.random.normal(ks[0], (outchannel, inchannel, 3, 3),
                                jnp.float32) * 0.1,
        "w2": jax.random.normal(ks[1], (outchannel, outchannel, 3, 3),
                                jnp.float32) * 0.1,
        "bn1_gamma": 1.0 + 0.1 * jax.random.normal(ks[2], (outchannel,), jnp.float32),
        "bn1_beta": 0.1 * jax.random.normal(ks[3], (outchannel,), jnp.float32),
        "bn1_mean": 0.05 * jax.random.normal(ks[4], (outchannel,), jnp.float32),
        "bn1_var": jnp.abs(1.0 + 0.1 * jax.random.normal(ks[5], (outchannel,), jnp.float32)),
        "bn2_gamma": 1.0 + 0.1 * jax.random.normal(ks[6], (outchannel,), jnp.float32),
        "bn2_beta": 0.1 * jax.random.normal(ks[7], (outchannel,), jnp.float32),
        "bn2_mean": jnp.zeros((outchannel,), jnp.float32),
        "bn2_var": jnp.ones((outchannel,), jnp.float32),
    }
    if stride != 1 or inchannel != outchannel:
        ks2 = jax.random.split(ks[0], 3)
        p["wsc"] = jax.random.normal(ks2[0], (outchannel, inchannel, 1, 1),
                                     jnp.float32) * 0.1
        p["bnsc_gamma"] = 1.0 + 0.1 * jax.random.normal(ks2[1], (outchannel,), jnp.float32)
        p["bnsc_beta"] = 0.1 * jax.random.normal(ks2[2], (outchannel,), jnp.float32)
        p["bnsc_mean"] = jnp.zeros((outchannel,), jnp.float32)
        p["bnsc_var"] = jnp.ones((outchannel,), jnp.float32)
    return p


def _fold_bn(gamma, beta, mean, var, eps=1e-5):
    scale = gamma / jnp.sqrt(var + eps)           # (C,)
    bias = beta - mean * scale                    # (C,)
    return scale, bias


def _prep_w3x3(w_oihw, scale):
    """(O,I,3,3) * scale[O] -> (9*I, O) bf16, row index = (kh*3+kw)*I + i."""
    O, I = w_oihw.shape[0], w_oihw.shape[1]
    wf = w_oihw * scale[:, None, None, None]
    wf = jnp.transpose(wf, (2, 3, 1, 0)).reshape(9 * I, O)
    return wf.astype(jnp.bfloat16)


def _pick_rows(total, target):
    # largest divisor of `total` that is <= target
    best = 1
    for d in range(1, total + 1):
        if total % d == 0 and d <= target:
            best = d
    return best


# ----------------------------------------------------------------------------
# ResBlock forward
# ----------------------------------------------------------------------------
def res_block_nhwc(x, params, stride, *, block_rows=32):
    """x: (N, H, W, Cin) bf16 NHWC -> (N, Ho, Wo, Cout) bf16 NHWC.

    Chain-friendly entry point: consecutive ResBlocks can stay NHWC/bf16 and
    skip the NCHW transposes entirely.
    """
    N, H, W, Cin = x.shape
    Cout = params["w1"].shape[0]
    assert H % stride == 0 and W % stride == 0
    Ho, Wo = H // stride, W // stride
    S_out = _pick_rows(Ho, block_rows)            # strip height (divides Ho)

    s1, b1 = _fold_bn(params["bn1_gamma"], params["bn1_beta"],
                      params["bn1_mean"], params["bn1_var"])
    s2, b2 = _fold_bn(params["bn2_gamma"], params["bn2_beta"],
                      params["bn2_mean"], params["bn2_var"])
    w1f = _prep_w3x3(params["w1"], s1)            # (9*Cin, Cout) bf16
    w2f = _prep_w3x3(params["w2"], s2)            # (9*Cout, Cout) bf16
    b1 = b1.reshape(1, Cout).astype(jnp.float32)
    b2 = b2.reshape(1, Cout).astype(jnp.float32)

    # conv1 (3x3, pad=1, stride) + folded BN + ReLU
    y1 = conv3x3_bn_relu(x, w1f, b1, stride=stride, S_out=S_out)

    # conv2 (3x3, stride 1) + folded BN + fused shortcut + add + ReLU
    use_conv_shortcut = (stride != 1) or (Cin != Cout)
    if use_conv_shortcut:
        ssc, bsc = _fold_bn(params["bnsc_gamma"], params["bnsc_beta"],
                            params["bnsc_mean"], params["bnsc_var"])
        wscf = (params["wsc"][:, :, 0, 0] * ssc[:, None]).T.astype(jnp.bfloat16)
        bscb = bsc.reshape(1, Cout).astype(jnp.float32)
        # Pre-decimate the residual for stride>1: the 1x1/stride shortcut only
        # reads every stride-th pixel, so don't DMA the full-res strip.
        resid = x[:, ::stride, ::stride, :] if stride != 1 else x
        return conv3x3_bn_add_relu(y1, w2f, b2, resid, wscf, bscb, S_out=S_out)
    return conv3x3_bn_add_relu(y1, w2f, b2, x, None, None, S_out=S_out)


def res_block(x_nchw, params, stride, *, block_rows=32):
    """PyTorch-parity entry point: NCHW f32 in, NCHW bf16 out (eval-mode BN)."""
    x = jnp.transpose(x_nchw, (0, 2, 3, 1)).astype(jnp.bfloat16)   # NHWC bf16
    out = res_block_nhwc(x, params, stride, block_rows=block_rows)
    return jnp.transpose(out, (0, 3, 1, 2))


# ----------------------------------------------------------------------------
# Pure-JAX reference (lax conv, f32) with matched bf16 rounding points
# ----------------------------------------------------------------------------
def res_block_ref(x_nchw, params, stride, eps=1e-5):
    f32 = jnp.float32

    def rbf16(v):
        return v.astype(jnp.bfloat16).astype(f32)

    def conv(x, w, s, pad):
        return jax.lax.conv_general_dilated(
            x, w, (s, s), ((pad, pad), (pad, pad)),
            dimension_numbers=("NCHW", "OIHW", "NCHW"),
            precision=jax.lax.Precision.HIGHEST)

    inC = x_nchw.shape[1]
    outC = params["w1"].shape[0]
    s1, b1 = _fold_bn(params["bn1_gamma"], params["bn1_beta"],
                      params["bn1_mean"], params["bn1_var"], eps)
    s2, b2 = _fold_bn(params["bn2_gamma"], params["bn2_beta"],
                      params["bn2_mean"], params["bn2_var"], eps)
    w1f = rbf16(params["w1"] * s1[:, None, None, None])
    w2f = rbf16(params["w2"] * s2[:, None, None, None])
    xr = rbf16(x_nchw.astype(f32))

    y1 = jnp.maximum(conv(xr, w1f, stride, 1) + b1[None, :, None, None], 0.0)
    y1 = rbf16(y1)                                 # y1 stored as bf16 by the kernel
    y2 = conv(y1, w2f, 1, 1) + b2[None, :, None, None]

    if stride != 1 or inC != outC:
        ssc, bsc = _fold_bn(params["bnsc_gamma"], params["bnsc_beta"],
                            params["bnsc_mean"], params["bnsc_var"], eps)
        wscf = rbf16(params["wsc"] * ssc[:, None, None, None])
        sc = conv(xr, wscf, stride, 0) + bsc[None, :, None, None]
    else:
        sc = xr
    return jnp.maximum(y2 + sc, 0.0)


# ----------------------------------------------------------------------------
if __name__ == "__main__":
    key = jax.random.PRNGKey(0)
    kx, kp1, kp2, kp3, kx3 = jax.random.split(key, 5)

    N, Cin, H, W = 2, 4, 16, 16
    Cout = 8
    x = jax.random.normal(kx, (N, Cin, H, W), jnp.float32)

    def max_rel_err(o_bf16, r_f32):
        # Kernel output is bf16 (perf review item); tolerance covers the final
        # bf16 rounding (<= ~0.4% relative) plus f32 accumulation-order noise.
        o = o_bf16.astype(jnp.float32)
        return float(jnp.max(jnp.abs(o - r_f32) / (1.0 + jnp.abs(r_f32))))

    # Case 1: stride=1, Cin != Cout (conv shortcut), 2 row strips per image.
    p1 = init_params(kp1, Cin, Cout, 1)
    o1 = jax.block_until_ready(res_block(x, p1, 1, block_rows=8))
    r1 = res_block_ref(x, p1, 1)
    assert o1.shape == (N, Cout, H, W)
    assert max_rel_err(o1, r1) < 1e-2

    # Case 2: stride=2 (strided conv + conv shortcut, decimated residual).
    p2 = init_params(kp2, Cin, Cout, 2)
    o2 = jax.block_until_ready(res_block(x, p2, 2, block_rows=8))
    r2 = res_block_ref(x, p2, 2)
    assert o2.shape == (N, Cout, H // 2, W // 2)
    assert max_rel_err(o2, r2) < 1e-2

    # Case 3: stride=1, Cin == Cout (identity shortcut).
    x3 = jax.random.normal(kx3, (N, Cout, H, W), jnp.float32)
    p3 = init_params(kp3, Cout, Cout, 1)
    o3 = jax.block_until_ready(res_block(x3, p3, 1, block_rows=8))
    r3 = res_block_ref(x3, p3, 1)
    assert o3.shape == (N, Cout, H, W)
    assert max_rel_err(o3, r3) < 1e-2

    print("KERNEL_OK")
</pallas_src>

<mosaic_0001>
module attributes {stable_mosaic.version = 11 : i64} {
  func.func @_conv3x3_bn_relu_kernel(%arg0: i32, %arg1: i32, %arg2: memref<1x8x16x4xbf16, #tpu.memory_space<vmem>>, %arg3: memref<1x1x16x4xbf16, #tpu.memory_space<vmem>>, %arg4: memref<1x1x16x4xbf16, #tpu.memory_space<vmem>>, %arg5: memref<36x8xbf16, #tpu.memory_space<vmem>>, %arg6: memref<1x8xf32, #tpu.memory_space<vmem>>, %arg7: memref<1x8x16x8xbf16, #tpu.memory_space<vmem>>, %arg8: memref<10x18x4xbf16, #tpu.memory_space<vmem>>) attributes {dimension_semantics = [#tpu.dimension_semantics<parallel>, #tpu.dimension_semantics<parallel>], iteration_bounds = array<i64: 2, 2>, scalar_prefetch = 0 : i64, scratch_operands = 1 : i64, tpu.core_type = #tpu.core_type<tc>, window_params = [{transform_indices = @transform_0, window_bounds = array<i64: 1, 8, 16, 4>}, {transform_indices = @transform_1, window_bounds = array<i64: 1, 1, 16, 4>}, {transform_indices = @transform_2, window_bounds = array<i64: 1, 1, 16, 4>}, {pipeline_mode = #tpu.pipeline_mode<synchronous>, transform_indices = @transform_3, window_bounds = array<i64: 36, 8>}, {pipeline_mode = #tpu.pipeline_mode<synchronous>, transform_indices = @transform_4, window_bounds = array<i64: 1, 8>}, {transform_indices = @transform_5, window_bounds = array<i64: 1, 8, 16, 8>}]} {
    %cst = arith.constant 0.000000e+00 : bf16
    %0 = vector.broadcast %cst : bf16 to vector<1x16x4xbf16>
    %c0 = arith.constant 0 : index
    %c0_0 = arith.constant 0 : index
    %c0_1 = arith.constant 0 : index
    %c0_2 = arith.constant 0 : index
    %1 = vector.load %arg2[%c0, %c0_0, %c0_1, %c0_2] : memref<1x8x16x4xbf16, #tpu.memory_space<vmem>>, vector<1x8x16x4xbf16>
    %2 = vector.shape_cast %1 : vector<1x8x16x4xbf16> to vector<8x16x4xbf16>
    %c1 = arith.constant 1 : index
    %c1_3 = arith.constant 1 : index
    %c0_4 = arith.constant 0 : index
    %3 = vector.load %arg8[%c1, %c1_3, %c0_4] : memref<10x18x4xbf16, #tpu.memory_space<vmem>>, vector<8x16x4xbf16>
    tpu.vector_store %arg8[%c1, %c1_3, %c0_4], %2 {strides = array<i32>} : memref<10x18x4xbf16, #tpu.memory_space<vmem>>, vector<8x16x4xbf16>,
    %c0_i32 = arith.constant 0 : i32
    %4 = arith.cmpi sgt, %arg1, %c0_i32 : i32
    %5 = arith.extui %4 : i1 to i32
    %c0_i32_5 = arith.constant 0 : i32
    %6 = arith.cmpi ne, %5, %c0_i32_5 : i32
    scf.if %6 {
      %c0_53 = arith.constant 0 : index
      %c0_54 = arith.constant 0 : index
      %c0_55 = arith.constant 0 : index
      %c0_56 = arith.constant 0 : index
      %50 = vector.load %arg3[%c0_53, %c0_54, %c0_55, %c0_56] : memref<1x1x16x4xbf16, #tpu.memory_space<vmem>>, vector<1x1x16x4xbf16>
      %51 = vector.shape_cast %50 : vector<1x1x16x4xbf16> to vector<1x16x4xbf16>
      %c0_57 = arith.constant 0 : index
      %c1_58 = arith.constant 1 : index
      %c0_59 = arith.constant 0 : index
      %52 = vector.load %arg8[%c0_57, %c1_58, %c0_59] : memref<10x18x4xbf16, #tpu.memory_space<vmem>>, vector<1x16x4xbf16>
      tpu.vector_store %arg8[%c0_57, %c1_58, %c0_59], %51 {strides = array<i32>} : memref<10x18x4xbf16, #tpu.memory_space<vmem>>, vector<1x16x4xbf16>,
    } else {
    }
    %c0_i32_6 = arith.constant 0 : i32
    %7 = arith.cmpi eq, %arg1, %c0_i32_6 : i32
    %8 = arith.extui %7 : i1 to i32
    %c0_i32_7 = arith.constant 0 : i32
    %9 = arith.cmpi ne, %8, %c0_i32_7 : i32
    scf.if %9 {
      %c0_53 = arith.constant 0 : index
      %c1_54 = arith.constant 1 : index
      %c0_55 = arith.constant 0 : index
      %50 = vector.load %arg8[%c0_53, %c1_54, %c0_55] : memref<10x18x4xbf16, #tpu.memory_space<vmem>>, vector<1x16x4xbf16>
      tpu.vector_store %arg8[%c0_53, %c1_54, %c0_55], %0 {strides = array<i32>} : memref<10x18x4xbf16, #tpu.memory_space<vmem>>, vector<1x16x4xbf16>,
    } else {
    }
    %c1_i32 = arith.constant 1 : i32
    %10 = arith.cmpi slt, %arg1, %c1_i32 : i32
    %11 = arith.extui %10 : i1 to i32
    %c0_i32_8 = arith.constant 0 : i32
    %12 = arith.cmpi ne, %11, %c0_i32_8 : i32
    scf.if %12 {
      %c0_53 = arith.constant 0 : index
      %c0_54 = arith.constant 0 : index
      %c0_55 = arith.constant 0 : index
      %c0_56 = arith.constant 0 : index
      %50 = vector.load %arg4[%c0_53, %c0_54, %c0_55, %c0_56] : memref<1x1x16x4xbf16, #tpu.memory_space<vmem>>, vector<1x1x16x4xbf16>
      %51 = vector.shape_cast %50 : vector<1x1x16x4xbf16> to vector<1x16x4xbf16>
      %c9 = arith.constant 9 : index
      %c1_57 = arith.constant 1 : index
      %c0_58 = arith.constant 0 : index
      %52 = vector.load %arg8[%c9, %c1_57, %c0_58] : memref<10x18x4xbf16, #tpu.memory_space<vmem>>, vector<1x16x4xbf16>
      tpu.vector_store %arg8[%c9, %c1_57, %c0_58], %51 {strides = array<i32>} : memref<10x18x4xbf16, #tpu.memory_space<vmem>>, vector<1x16x4xbf16>,
    } else {
    }
    %c1_i32_9 = arith.constant 1 : i32
    %13 = arith.cmpi eq, %arg1, %c1_i32_9 : i32
    %14 = arith.extui %13 : i1 to i32
    %c0_i32_10 = arith.constant 0 : i32
    %15 = arith.cmpi ne, %14, %c0_i32_10 : i32
    scf.if %15 {
      %c9 = arith.constant 9 : index
      %c1_53 = arith.constant 1 : index
      %c0_54 = arith.constant 0 : index
      %50 = vector.load %arg8[%c9, %c1_53, %c0_54] : memref<10x18x4xbf16, #tpu.memory_space<vmem>>, vector<1x16x4xbf16>
      tpu.vector_store %arg8[%c9, %c1_53, %c0_54], %0 {strides = array<i32>} : memref<10x18x4xbf16, #tpu.memory_space<vmem>>, vector<1x16x4xbf16>,
    } else {
    }
    %cst_11 = arith.constant 0.000000e+00 : bf16
    %16 = vector.broadcast %cst_11 : bf16 to vector<10x1x4xbf16>
    %c0_12 = arith.constant 0 : index
    %c0_13 = arith.constant 0 : index
    %c0_14 = arith.constant 0 : index
    %17 = vector.load %arg8[%c0_12, %c0_13, %c0_14] : memref<10x18x4xbf16, #tpu.memory_space<vmem>>, vector<10x1x4xbf16>
    tpu.vector_store %arg8[%c0_12, %c0_13, %c0_14], %16 {strides = array<i32>} : memref<10x18x4xbf16, #tpu.memory_space<vmem>>, vector<10x1x4xbf16>,
    %c0_15 = arith.constant 0 : index
    %c17 = arith.constant 17 : index
    %c0_16 = arith.constant 0 : index
    %18 = vector.load %arg8[%c0_15, %c17, %c0_16] : memref<10x18x4xbf16, #tpu.memory_space<vmem>>, vector<10x1x4xbf16>
    tpu.vector_store %arg8[%c0_15, %c17, %c0_16], %16 {strides = array<i32>} : memref<10x18x4xbf16, #tpu.memory_space<vmem>>, vector<10x1x4xbf16>,
    %c0_17 = arith.constant 0 : index
    %c0_18 = arith.constant 0 : index
    %c0_19 = arith.constant 0 : index
    %19 = vector.load %arg8[%c0_17, %c0_18, %c0_19] : memref<10x18x4xbf16, #tpu.memory_space<vmem>>, vector<8x16x4xbf16>
    %20 = vector.shape_cast %19 : vector<8x16x4xbf16> to vector<128x4xbf16>
    %c0_20 = arith.constant 0 : index
    %c1_21 = arith.constant 1 : index
    %c0_22 = arith.constant 0 : index
    %21 = vector.load %arg8[%c0_20, %c1_21, %c0_22] : memref<10x18x4xbf16, #tpu.memory_space<vmem>>, vector<8x16x4xbf16>
    %22 = vector.shape_cast %21 : vector<8x16x4xbf16> to vector<128x4xbf16>
    %c0_23 = arith.constant 0 : index
    %c2 = arith.constant 2 : index
    %c0_24 = arith.constant 0 : index
    %23 = vector.load %arg8[%c0_23, %c2, %c0_24] : memref<10x18x4xbf16, #tpu.memory_space<vmem>>, vector<8x16x4xbf16>
    %24 = vector.shape_cast %23 : vector<8x16x4xbf16> to vector<128x4xbf16>
    %c1_25 = arith.constant 1 : index
    %c0_26 = arith.constant 0 : index
    %c0_27 = arith.constant 0 : index
    %25 = vector.load %arg8[%c1_25, %c0_26, %c0_27] : memref<10x18x4xbf16, #tpu.memory_space<vmem>>, vector<8x16x4xbf16>
    %26 = vector.shape_cast %25 : vector<8x16x4xbf16> to vector<128x4xbf16>
    %c1_28 = arith.constant 1 : index
    %c1_29 = arith.constant 1 : index
    %c0_30 = arith.constant 0 : index
    %27 = vector.load %arg8[%c1_28, %c1_29, %c0_30] : memref<10x18x4xbf16, #tpu.memory_space<vmem>>, vector<8x16x4xbf16>
    %28 = vector.shape_cast %27 : vector<8x16x4xbf16> to vector<128x4xbf16>
    %c1_31 = arith.constant 1 : index
    %c2_32 = arith.constant 2 : index
    %c0_33 = arith.constant 0 : index
    %29 = vector.load %arg8[%c1_31, %c2_32, %c0_33] : memref<10x18x4xbf16, #tpu.memory_space<vmem>>, vector<8x16x4xbf16>
    %30 = vector.shape_cast %29 : vector<8x16x4xbf16> to vector<128x4xbf16>
    %c2_34 = arith.constant 2 : index
    %c0_35 = arith.constant 0 : index
    %c0_36 = arith.constant 0 : index
    %31 = vector.load %arg8[%c2_34, %c0_35, %c0_36] : memref<10x18x4xbf16, #tpu.memory_space<vmem>>, vector<8x16x4xbf16>
    %32 = vector.shape_cast %31 : vector<8x16x4xbf16> to vector<128x4xbf16>
    %c2_37 = arith.constant 2 : index
    %c1_38 = arith.constant 1 : index
    %c0_39 = arith.constant 0 : index
    %33 = vector.load %arg8[%c2_37, %c1_38, %c0_39] : memref<10x18x4xbf16, #tpu.memory_space<vmem>>, vector<8x16x4xbf16>
    %34 = vector.shape_cast %33 : vector<8x16x4xbf16> to vector<128x4xbf16>
    %c2_40 = arith.constant 2 : index
    %c2_41 = arith.constant 2 : index
    %c0_42 = arith.constant 0 : index
    %35 = vector.load %arg8[%c2_40, %c2_41, %c0_42] : memref<10x18x4xbf16, #tpu.memory_space<vmem>>, vector<8x16x4xbf16>
    %36 = vector.shape_cast %35 : vector<8x16x4xbf16> to vector<128x4xbf16>
    %37 = tpu.concatenate %20, %22, %24, %26, %28, %30, %32, %34, %36 in 1 : vector<128x4xbf16>, vector<128x4xbf16>, vector<128x4xbf16>, vector<128x4xbf16>, vector<128x4xbf16>, vector<128x4xbf16>, vector<128x4xbf16>, vector<128x4xbf16>, vector<128x4xbf16> -> vector<128x36xbf16>
    %c0_43 = arith.constant 0 : index
    %c0_44 = arith.constant 0 : index
    %38 = vector.load %arg5[%c0_43, %c0_44] : memref<36x8xbf16, #tpu.memory_space<vmem>>, vector<36x8xbf16>
    %cst_45 = arith.constant dense<0.000000e+00> : vector<128x8xf32>
    %39 = tpu.matmul %37, %38, %cst_45 {dimension_numbers = #tpu.dot_dimension_numbers<[1], [0], [0], [1], [0, 0, 1, 1], [], []>} : vector<128x36xbf16>, vector<36x8xbf16>, vector<128x8xf32> -> vector<128x8xf32>
    %c0_46 = arith.constant 0 : index
    %c0_47 = arith.constant 0 : index
    %40 = vector.load %arg6[%c0_46, %c0_47] : memref<1x8xf32, #tpu.memory_space<vmem>>, vector<1x8xf32>
    %41 = vector.broadcast %40 : vector<1x8xf32> to vector<128x8xf32>
    %42 = arith.addf %39, %41 : vector<128x8xf32>
    %cst_48 = arith.constant 0.000000e+00 : f32
    %43 = vector.broadcast %cst_48 : f32 to vector<128x8xf32>
    %44 = arith.maximumf %42, %43 : vector<128x8xf32>
    %45 = vector.shape_cast %44 : vector<128x8xf32> to vector<8x16x8xf32>
    %46 = arith.truncf %45 : vector<8x16x8xf32> to vector<8x16x8xbf16>
    %c0_49 = arith.constant 0 : index
    %c0_50 = arith.constant 0 : index
    %c0_51 = arith.constant 0 : index
    %c0_52 = arith.constant 0 : index
    %47 = vector.load %arg7[%c0_49, %c0_50, %c0_51, %c0_52] : memref<1x8x16x8xbf16, #tpu.memory_space<vmem>>, vector<1x8x16x8xbf16>
    %48 = vector.shape_cast %47 : vector<1x8x16x8xbf16> to vector<8x16x8xbf16>
    %49 = vector.shape_cast %46 : vector<8x16x8xbf16> to vector<1x8x16x8xbf16>
    tpu.vector_store %arg7[%c0_49, %c0_50, %c0_51, %c0_52], %49 {strides = array<i32>} : memref<1x8x16x8xbf16, #tpu.memory_space<vmem>>, vector<1x8x16x8xbf16>,
    return
  }
  func.func @transform_0(%arg0: i32, %arg1: i32) -> (i32, i32, i32, i32) {
    %c0_i32 = arith.constant 0 : i32
    %c0_i32_0 = arith.constant 0 : i32
    %c0_i32_1 = arith.constant 0 : i32
    return %arg0, %arg1, %c0_i32, %c0_i32_0 : i32, i32, i32, i32
  }
  func.func @transform_1(%arg0: i32, %arg1: i32) -> (i32, i32, i32, i32) {
    %c8_i32 = arith.constant 8 : i32
    %0 = arith.muli %arg1, %c8_i32 : i32
    %c1_i32 = arith.constant 1 : i32
    %1 = arith.subi %0, %c1_i32 : i32
    %c0_i32 = arith.constant 0 : i32
    %2 = arith.maxsi %1, %c0_i32 : i32
    %c0_i32_0 = arith.constant 0 : i32
    %c0_i32_1 = arith.constant 0 : i32
    %c0_i32_2 = arith.constant 0 : i32
    return %arg0, %2, %c0_i32_0, %c0_i32_1 : i32, i32, i32, i32
  }
  func.func @transform_2(%arg0: i32, %arg1: i32) -> (i32, i32, i32, i32) {
    %c1_i32 = arith.constant 1 : i32
    %0 = arith.addi %arg1, %c1_i32 : i32
    %c8_i32 = arith.constant 8 : i32
    %1 = arith.muli %0, %c8_i32 : i32
    %c15_i32 = arith.constant 15 : i32
    %2 = arith.minsi %1, %c15_i32 : i32
    %c0_i32 = arith.constant 0 : i32
    %c0_i32_0 = arith.constant 0 : i32
    %c0_i32_1 = arith.constant 0 : i32
    return %arg0, %2, %c0_i32, %c0_i32_0 : i32, i32, i32, i32
  }
  func.func @transform_3(%arg0: i32, %arg1: i32) -> (i32, i32) {
    %c0_i32 = arith.constant 0 : i32
    %c0_i32_0 = arith.constant 0 : i32
    %c0_i32_1 = arith.constant 0 : i32
    return %c0_i32, %c0_i32_0 : i32, i32
  }
  func.func @transform_4(%arg0: i32, %arg1: i32) -> (i32, i32) {
    %c0_i32 = arith.constant 0 : i32
    %c0_i32_0 = arith.constant 0 : i32
    %c0_i32_1 = arith.constant 0 : i32
    return %c0_i32, %c0_i32_0 : i32, i32
  }
  func.func @transform_5(%arg0: i32, %arg1: i32) -> (i32, i32, i32, i32) {
    %c0_i32 = arith.constant 0 : i32
    %c0_i32_0 = arith.constant 0 : i32
    %c0_i32_1 = arith.constant 0 : i32
    return %arg0, %arg1, %c0_i32, %c0_i32_0 : i32, i32, i32, i32
  }
}

</mosaic_0001>

<bundles_post_ra>
// kernel: tpu_custom_call.1
= control target key start
LH: loop header
LB: loop body
LE: loop exit
PB: predicated region body
PF: predicated region fallthrough
CT: control target
= control target key end

     0   :  { %s2854_s18 = smov 0   ;;  %s2856_s19 = smov 0   ;;  %s3755_s0 = inlined_call_operand.vmem [shape: bf16[2,16,16,4], index: 0, kind: input, shape index: {}]   ;;  %s3756_s1 = inlined_call_operand.vmem [shape: bf16[2,16,16,4], index: 1, kind: input, shape index: {}]   ;;  %s3757_s2 = inlined_call_operand.vmem [shape: bf16[2,16,16,4], index: 2, kind: input, shape index: {}]   ;;  %s3758_s3 = inlined_call_operand.vmem [shape: bf16[36,8], index: 3, kind: input, shape index: {}]   ;;  %s3759_s4 = inlined_call_operand.vmem [shape: f32[1,8], index: 4, kind: input, shape index: {}]   ;;  %s3760_s5 = inlined_call_operand.vmem [shape: bf16[2,16,16,8], index: 5, kind: output, shape index: {}]  }
   0x1   :  { %s2858_s20 = smov 0   ;;  %s2860_s21 = smov 0  }
   0x2   :  { %s2862_s22 = smov 0  }
   0x3 LB: > { %s24_s23 = sadd.s32 1, %s2804_s20  ;;  %s27_s24 = sadd.s32 1, %s2808_s21  ;;  %s2812_s22 = sphi %s2862_s22, %s15_s22   ;;  %s2808_s21 = sphi %s2860_s21, %s3777_s21   ;;  %s2804_s20 = sphi %s2858_s20, %s3776_s20   ;;  %s2800_s19 = sphi %s2856_s19, %s3775_s19   ;;  %s2796_s18 = sphi %s2854_s18, %s3774_s18  }
   0x4   : > { %p25_p0 = scmp.ge.s32.totalorder %s24_s23, 2  ;;  %p2512_p1 = scmp.ge.s32.totalorder %s2812_s22, 1 }
   0x5   : > { %p273_p2 = scmp.lt.s32.totalorder %s2812_s22, 5 }
   0x6   : > { %s3779_s23 = smov (%p25_p0, %s24_s23), 0  ;;  %s3781_s24 = smov (!%p25_p0, %s27_s24), %s2808_s21 }
   0x7   : > { %p274_p3 = pnand %p2512_p1, %p273_p2  ;;  %p29_p4 = scmp.ge.s32.totalorder %s3781_s24, 2 }
   0x8   : > { %s2513_s25 = sshll.u32 (!%p274_p3), %s2796_s18, 3  ;;  %p338_p5 = scmp.lt.s32.totalorder (!%p274_p3), %s2800_s19, 1 }
   0x9   : > { %s3783_s24 = smov (%p29_p4, %s3781_s24), 0  ;;  %277 = sbr.rel (%p274_p3) target bundleno = 557 (0x22d), region = 40 }
   0xa   : > { %p340_p6 = scmp.lt.s32.totalorder (!%p274_p3), %s2513_s25, 15  ;;  %s2518_s26 = sadd.s32 (!%p274_p3), 4294967295, %s2513_s25 }
   0xb   : > { %p350_p7 = scmp.gt.s32.totalorder (!%p274_p3), %s2518_s26, 0  ;;  %p2519_p8 = scmp.lt.s32.totalorder (!%p274_p3), %s2518_s26, 15 }
   0xc   : > { %s2687_s6 = sadd.s32 (!%p274_p3), 8, %s2513_s25  ;;  %p2538_p10 = scmp.le.s32.totalorder (!%p274_p3), %s2796_s18, 0 }
   0xd   : > { %p2890_p9 = scmp.lt.s32.totalorder (!%p274_p3), %s2687_s6, 15 }
   0xe   : > { %s3785_s19 = smov (!%p338_p5, %s2800_s19), 1  ;;  %vm574_vm0 = vcmask 27648   ;;  %vm575_vm1 = vsmask.f32 7938  ;;  %vm410_vm2 = vsmask.f32 256 }
   0xf   : > { %s341_s27 = scalar_select %p340_p6, %s2513_s25, 15  ;;  %vm411_vm3 = vsmask.f32 4368  ;;  %vm582_vm4 = vcmask 24576   ;;  %vm2911_vm5 = vmand %vm574_vm0, %vm575_vm1  ;;  %v577_v7 = vld [vmem:[#allocation2 + $0xc] sm:$0xf] }
  0x10   : > { %s2887_s28 = sshll.u32 %s3785_s19, 5  ;;  %s3787_s6 = smov (!%p2890_p9, %s2687_s6), 15  ;;  %vm2921_vm6 = vmand %vm582_vm4, %vm410_vm2  ;;  %v584_v13 = vld [vmem:[#allocation2 + $0x14] sm:$0x1]  ;;  %v587_v24 = vld [vmem:[#allocation2 + $0x18] sm:$0xf] }
  0x11   : > { %s2514_s29 = sshll.u32 %s341_s27, 1  ;;  %s3791_s6 = smov (!%p2890_p9, %s3787_s6), 15  ;;  %vm2927_vm7 = vmor %vm410_vm2, %vm411_vm3  ;;  %v591_v25 = vld [vmem:[#allocation2 + $0x20] sm:$0x1]  ;;  %v594_v41 = vld [vmem:[#allocation2 + $0x24] sm:$0xf] }
  0x12   : > { %s344_s30 = sadd.s32 %s2887_s28, %s2514_s29  ;;  %s2531_s19 = sshll.u32 %s3791_s6, 1  ;;  %v598_v42 = vld [vmem:[#allocation2 + $0x2c] sm:$0x1]  ;;  %v601_v57 = vld [vmem:[#allocation2 + $0x30] sm:$0xf] }
  0x13   : > { %s2516_s7 = sshll.u32 %s344_s30, 2 }
  0x14   : > { %s2897_s11 = scalar_lea.vmem %s3755_s0, %s2516_s7  ;;  %s2902_s14 = scalar_lea.vmem %s3760_s5, %s2516_s7 }
  0x15   : > { %s351_s15 = scalar_select %p350_p7, %s2518_s26, 0  ;;  %v394_v0 = vld [vmem:[%s2897_s11] sm:$0xf]  ;;  %v395_v1 = vld [vmem:[%s2897_s11 + $0x4] sm:$0xf] }
  0x16   : > { %v414_v2 = vshrl.u32 %v394_v0, 16  ;;  %v417_v3 = vshll.u32 %v394_v0, 16  ;;  %v422_v4 = vshrl.u32 %v395_v1, 16  ;;  %v425_v5 = vshll.u32 %v395_v1, 16  ;;  %v396_v8 = vld [vmem:[%s2897_s11 + $0x8] sm:$0xf]  ;;  %s375_s26 = sadd.s32 %s2531_s19, %s2887_s28 }
  0x17   : > { %s3789_s15 = smov (!%p2519_p8, %s351_s15), 15  ;;  %v397_v9 = vld [vmem:[%s2897_s11 + $0xc] sm:$0xf]  ;;  %v431_v14 = vshrl.u32 %v396_v8, 16  ;;  %v434_v16 = vshll.u32 %v396_v8, 16  ;;  %s2533_s6 = sshll.u32 %s375_s26, 2 }
  0x18   : > { %v416_v10 = vrot.slane %v414_v2, 7  ;;  %v424_v11 = vrot.slane %v422_v4, 7  ;;  %s2524_s16 = sshll.u32 %s3789_s15, 1  ;;  %v439_v17 = vshrl.u32 %v397_v9, 16  ;;  %v442_v18 = vshll.u32 %v397_v9, 16  ;;  %s2951_s8 = scalar_lea.vmem %s3757_s2, %s2533_s6 }
  0x19   : > { %v398_v19 = vld [vmem:[%s2897_s11 + $0x10] sm:$0xf]  ;;  %s358_s17 = sadd.s32 %s2524_s16, %s2887_s28  ;;  %v399_v26 = vld [vmem:[%s2897_s11 + $0x14] sm:$0xf]  ;;  %v433_v27 = vrot.slane %v431_v14, 7 }
  0x1a   : > { %v419_v20 = vor.u32 %v417_v3, %v416_v10  ;;  %v420_v21 = vrot.slane %v416_v10, 4  ;;  %v427_v22 = vor.u32 %v425_v5, %v424_v11  ;;  %v429_v23 = vrot.slane %v424_v11, 4  ;;  %s2526_s25 = sshll.u32 %s358_s17, 2  ;;  %v400_v35 = vld [vmem:[%s2897_s11 + $0x18] sm:$0xf] }
  0x1b   : > { %v441_v28 = vrot.slane %v439_v17, 7  ;;  %v448_v29 = vshrl.u32 %v398_v19, 16  ;;  %v451_v30 = vshll.u32 %v398_v19, 16  ;;  %s2938_s30 = scalar_lea.vmem %s3756_s1, %s2526_s25  ;;  %v456_v34 = vshrl.u32 %v399_v26, 16  ;;  %v401_v36 = vld [vmem:[%s2897_s11 + $0x1c] sm:$0xf] }
  0x1c   : > { %v578_v31 = vsel %vm2911_vm5, %v419_v20, %v577_v7  ;;  %v428_v32 = vsel %vm2927_vm7, %v420_v21, %v427_v22  ;;  %v585_v33 = vsel %vm2921_vm6, %v429_v23, %v584_v13  ;;  %v436_v37 = vor.u32 %v434_v16, %v433_v27  ;;  %v402_v43 = vld [vmem:[%s2897_s11 + $0x20] sm:$0xf]  ;;  %v403_v52 = vld [vmem:[%s2897_s11 + $0x24] sm:$0xf]  ;;  %v404_v58 = vld [vmem:[%s2897_s11 + $0x28] sm:$0xf] }
  0x1d   : > { %579 = vst [vmem:[#allocation2 + $0xc] sm:$0xf] %v578_v31  ;;  %v437_v38 = vrot.slane %v433_v27, 4  ;;  %v444_v39 = vor.u32 %v442_v18, %v441_v28  ;;  %v446_v40 = vrot.slane %v441_v28, 4  ;;  %v450_v44 = vrot.slane %v448_v29, 7 }
  0x1e   : > { %581 = vst.msk [vmem:[#allocation2 + $0x10] sm:$0xf] %vm574_vm0, %v428_v32  ;;  %v458_v45 = vrot.slane %v456_v34, 7  ;;  %v459_v46 = vshll.u32 %v399_v26, 16  ;;  %v465_v47 = vshrl.u32 %v400_v35, 16  ;;  %v588_v48 = vsel %vm2911_vm5, %v436_v37, %v587_v24 }
  0x1f   : > { %586 = vst [vmem:[#allocation2 + $0x14] sm:$0x1] %v585_v33  ;;  %v445_v49 = vsel %vm2927_vm7, %v437_v38, %v444_v39  ;;  %v592_v50 = vsel %vm2921_vm6, %v446_v40, %v591_v25  ;;  %v468_v51 = vshll.u32 %v400_v35, 16  ;;  %v453_v53 = vor.u32 %v451_v30, %v450_v44  ;;  %v605_v2 = vld [vmem:[#allocation2 + $0x38] sm:$0x1] }
  0x20   : > { %589 = vst [vmem:[#allocation2 + $0x18] sm:$0xf] %v588_v48  ;;  %v454_v54 = vrot.slane %v450_v44, 4  ;;  %v461_v55 = vor.u32 %v459_v46, %v458_v45  ;;  %v463_v56 = vrot.slane %v458_v45, 4  ;;  %v467_v59 = vrot.slane %v465_v47, 7 }
  0x21   : > { %590 = vst.msk [vmem:[#allocation2 + $0x1c] sm:$0xf] %vm574_vm0, %v445_v49  ;;  %v473_v60 = vshrl.u32 %v401_v36, 16  ;;  %v476_v61 = vshll.u32 %v401_v36, 16  ;;  %v482_v62 = vshrl.u32 %v402_v43, 16  ;;  %v595_v63 = vsel %vm2911_vm5, %v453_v53, %v594_v41 }
  0x22   : > { %593 = vst [vmem:[#allocation2 + $0x20] sm:$0x1] %v592_v50  ;;  %v462_v0 = vsel %vm2927_vm7, %v454_v54, %v461_v55  ;;  %v599_v1 = vsel %vm2921_vm6, %v463_v56, %v598_v42  ;;  %v485_v3 = vshll.u32 %v402_v43, 16  ;;  %v608_v4 = vld [vmem:[#allocation2 + $0x3c] sm:$0xf]  ;;  %v470_v7 = vor.u32 %v468_v51, %v467_v59 }
  0x23   : > { %v405_v5 = vld [vmem:[%s2897_s11 + $0x2c] sm:$0xf]  ;;  %596 = vst [vmem:[#allocation2 + $0x24] sm:$0xf] %v595_v63  ;;  %v471_v8 = vrot.slane %v467_v59, 4  ;;  %v475_v9 = vrot.slane %v473_v60, 7 }
  0x24   : > { %v484_v10 = vrot.slane %v482_v62, 7  ;;  %597 = vst.msk [vmem:[#allocation2 + $0x28] sm:$0xf] %vm574_vm0, %v462_v0  ;;  %v490_v11 = vshrl.u32 %v403_v52, 16  ;;  %v493_v13 = vshll.u32 %v403_v52, 16  ;;  %v499_v14 = vshrl.u32 %v404_v58, 16 }
  0x25   : > { %v502_v16 = vshll.u32 %v404_v58, 16  ;;  %600 = vst [vmem:[#allocation2 + $0x2c] sm:$0x1] %v599_v1  ;;  %v602_v17 = vsel %vm2911_vm5, %v470_v7, %v601_v57  ;;  %v478_v18 = vor.u32 %v476_v61, %v475_v9  ;;  %v480_v19 = vrot.slane %v475_v9, 4  ;;  %v612_v21 = vld [vmem:[#allocation2 + $0x44] sm:$0x1] }
  0x26   : > { %v487_v20 = vor.u32 %v485_v3, %v484_v10  ;;  %v615_v22 = vld [vmem:[#allocation2 + $0x48] sm:$0xf]  ;;  %v406_v23 = vld [vmem:[%s2897_s11 + $0x30] sm:$0xf]  ;;  %603 = vst [vmem:[#allocation2 + $0x30] sm:$0xf] %v602_v17 }
  0x27   : > { %v488_v24 = vrot.slane %v484_v10, 4  ;;  %v492_v25 = vrot.slane %v490_v11, 7  ;;  %v501_v26 = vrot.slane %v499_v14, 7  ;;  %v507_v27 = vshrl.u32 %v405_v5, 16  ;;  %v407_v32 = vld [vmem:[%s2897_s11 + $0x34] sm:$0xf] }
  0x28   : > { %v479_v28 = vsel %vm2927_vm7, %v471_v8, %v478_v18  ;;  %v606_v29 = vsel %vm2921_vm6, %v480_v19, %v605_v2  ;;  %v609_v30 = vsel %vm2911_vm5, %v487_v20, %v608_v4  ;;  %v510_v31 = vshll.u32 %v405_v5, 16  ;;  %v408_v33 = vld [vmem:[%s2897_s11 + $0x38] sm:$0xf]  ;;  %v619_v38 = vld [vmem:[#allocation2 + $0x50] sm:$0x1] }
  0x29   : > { %604 = vst.msk [vmem:[#allocation2 + $0x34] sm:$0xf] %vm574_vm0, %v479_v28  ;;  %v495_v34 = vor.u32 %v493_v13, %v492_v25  ;;  %v497_v35 = vrot.slane %v492_v25, 4  ;;  %v504_v36 = vor.u32 %v502_v16, %v501_v26  ;;  %v505_v37 = vrot.slane %v501_v26, 4  ;;  %v409_v39 = vld [vmem:[%s2897_s11 + $0x3c] sm:$0xf] }
  0x2a   : > { %607 = vst [vmem:[#allocation2 + $0x38] sm:$0x1] %v606_v29  ;;  %v509_v40 = vrot.slane %v507_v27, 7  ;;  %v516_v41 = vshrl.u32 %v406_v23, 16  ;;  %v519_v42 = vshll.u32 %v406_v23, 16  ;;  %v524_v43 = vshrl.u32 %v407_v32, 16 }
  0x2b   : > { %610 = vst [vmem:[#allocation2 + $0x3c] sm:$0xf] %v609_v30  ;;  %v496_v44 = vsel %vm2927_vm7, %v488_v24, %v495_v34  ;;  %v613_v45 = vsel %vm2921_vm6, %v497_v35, %v612_v21  ;;  %v616_v46 = vsel %vm2911_vm5, %v504_v36, %v615_v22  ;;  %v622_v47 = vld [vmem:[#allocation2 + $0x54] sm:$0xf]  ;;  %v527_v48 = vshll.u32 %v407_v32, 16 }
  0x2c   : > { %611 = vst.msk [vmem:[#allocation2 + $0x40] sm:$0xf] %vm574_vm0, %v496_v44  ;;  %v512_v49 = vor.u32 %v510_v31, %v509_v40  ;;  %v514_v50 = vrot.slane %v509_v40, 4  ;;  %v518_v51 = vrot.slane %v516_v41, 7  ;;  %v526_v52 = vrot.slane %v524_v43, 7 }
  0x2d   : > { %614 = vst [vmem:[#allocation2 + $0x44] sm:$0x1] %v613_v45  ;;  %v533_v53 = vshrl.u32 %v408_v33, 16  ;;  %v536_v54 = vshll.u32 %v408_v33, 16  ;;  %v541_v55 = vshrl.u32 %v409_v39, 16  ;;  %v544_v56 = vshll.u32 %v409_v39, 16 }
  0x2e   : > { %617 = vst [vmem:[#allocation2 + $0x48] sm:$0xf] %v616_v46  ;;  %v513_v57 = vsel %vm2927_vm7, %v505_v37, %v512_v49  ;;  %v620_v58 = vsel %vm2921_vm6, %v514_v50, %v619_v38  ;;  %v521_v59 = vor.u32 %v519_v42, %v518_v51  ;;  %v522_v60 = vrot.slane %v518_v51, 4  ;;  %v626_v61 = vld [vmem:[#allocation2 + $0x5c] sm:$0x1] }
  0x2f   : > { %618 = vst.msk [vmem:[#allocation2 + $0x4c] sm:$0xf] %vm574_vm0, %v513_v57  ;;  %v529_v62 = vor.u32 %v527_v48, %v526_v52  ;;  %v531_v63 = vrot.slane %v526_v52, 4  ;;  %v535_v0 = vrot.slane %v533_v53, 7  ;;  %v543_v1 = vrot.slane %v541_v55, 7 }
  0x30   : > { %621 = vst [vmem:[#allocation2 + $0x50] sm:$0x1] %v620_v58  ;;  %v623_v2 = vsel %vm2911_vm5, %v521_v59, %v622_v47  ;;  %v629_v3 = vld [vmem:[#allocation2 + $0x60] sm:$0xf]  ;;  %v633_v9 = vld [vmem:[#allocation2 + $0x68] sm:$0x1] }
  0x31   : > { %624 = vst [vmem:[#allocation2 + $0x54] sm:$0xf] %v623_v2  ;;  %v530_v4 = vsel %vm2927_vm7, %v522_v60, %v529_v62  ;;  %v627_v5 = vsel %vm2921_vm6, %v531_v63, %v626_v61  ;;  %v538_v7 = vor.u32 %v536_v54, %v535_v0  ;;  %v539_v8 = vrot.slane %v535_v0, 4 }
  0x32   : > { %625 = vst.msk [vmem:[#allocation2 + $0x58] sm:$0xf] %vm574_vm0, %v530_v4  ;;  %v546_v10 = vor.u32 %v544_v56, %v543_v1  ;;  %v548_v11 = vrot.slane %v543_v1, 4  ;;  %639 = sbr.rel (%p2538_p10) target bundleno = 66 (0x42), region = 44 }
  0x33   : > { %628 = vst [vmem:[#allocation2 + $0x5c] sm:$0x1] %v627_v5  ;;  %v630_v13 = vsel %vm2911_vm5, %v538_v7, %v629_v3 }
  0x34   : > { %631 = vst [vmem:[#allocation2 + $0x60] sm:$0xf] %v630_v13  ;;  %v547_v14 = vsel %vm2927_vm7, %v539_v8, %v546_v10  ;;  %v634_v16 = vsel %vm2921_vm6, %v548_v11, %v633_v9 }
  0x35   : > { %632 = vst.msk [vmem:[#allocation2 + $0x64] sm:$0xf] %vm574_vm0, %v547_v14 }
  0x36   : > { %635 = vst [vmem:[#allocation2 + $0x68] sm:$0x1] %v634_v16 }
  0x37   : > { %v640_v17 = vld [vmem:[%s2938_s30] sm:$0xf]  ;;  %v641_v18 = vld [vmem:[%s2938_s30 + $0x4] sm:$0xf]  ;;  %v666_v26 = vld [vmem:[#allocation2 + $0x8] sm:$0x1] }
  0x38   : > { %v643_v19 = vshrl.u32 %v640_v17, 16  ;;  %v646_v20 = vshll.u32 %v640_v17, 16  ;;  %v651_v21 = vshrl.u32 %v641_v18, 16  ;;  %v654_v22 = vshll.u32 %v641_v18, 16  ;;  %v662_v25 = vld [vmem:[#allocation2] sm:$0xf] }
  0x3a   : > { %v645_v23 = vrot.slane %v643_v19, 7  ;;  %v653_v24 = vrot.slane %v651_v21, 7 }
  0x3c   : > { %v648_v27 = vor.u32 %v646_v20, %v645_v23  ;;  %v649_v28 = vrot.slane %v645_v23, 4  ;;  %v656_v29 = vor.u32 %v654_v22, %v653_v24  ;;  %v658_v30 = vrot.slane %v653_v24, 4 }
  0x3e   : > { %v663_v31 = vsel %vm2911_vm5, %v648_v27, %v662_v25  ;;  %v657_v32 = vsel %vm2927_vm7, %v649_v28, %v656_v29  ;;  %v667_v33 = vsel %vm2921_vm6, %v658_v30, %v666_v26 }
  0x3f   : > { %664 = vst [vmem:[#allocation2] sm:$0xf] %v663_v31 }
  0x40   : > { %665 = vst.msk [vmem:[#allocation2 + $0x4] sm:$0xf] %vm574_vm0, %v657_v32 }
  0x41   : > { %668 = vst [vmem:[#allocation2 + $0x8] sm:$0x1] %v667_v33 }
  0x42 PF: > { %p2539_p11 = scmp.ne.s32.totalorder %s2796_s18, 0 }
  0x44   : > { %672 = sbr.rel (%p2539_p11) target bundleno = 77 (0x4d), region = 48 }
  0x49   : > { %v673_v34 = vld [vmem:[#allocation2] sm:$0xf]  ;;  %v677_v35 = vld [vmem:[#allocation2 + $0x8] sm:$0x1]  ;;  %v2814_v37 = vmov 0  }
  0x4a   : > { %v674_v36 = vsel %vm2911_vm5, 0, %v673_v34  ;;  %676 = vst.msk [vmem:[#allocation2 + $0x4] sm:$0xf] %vm574_vm0, %v2814_v37  ;;  %v678_v38 = vsel %vm2921_vm6, 0, %v677_v35 }
  0x4b   : > { %675 = vst [vmem:[#allocation2] sm:$0xf] %v674_v36 }
  0x4c   : > { %679 = vst [vmem:[#allocation2 + $0x8] sm:$0x1] %v678_v38 }
  0x4d PF: > { %p2540_p12 = scmp.ge.s32.totalorder %s2796_s18, 1 }
  0x4f   : > { %683 = sbr.rel (%p2540_p12) target bundleno = 95 (0x5f), region = 52 }
  0x54   : > { %v684_v39 = vld [vmem:[%s2951_s8] sm:$0xf]  ;;  %v685_v40 = vld [vmem:[%s2951_s8 + $0x4] sm:$0xf]  ;;  %v707_v47 = vld [vmem:[#allocation2 + $0x6c] sm:$0xf] }
  0x55   : > { %v687_v41 = vshrl.u32 %v684_v39, 16  ;;  %v690_v42 = vshll.u32 %v684_v39, 16  ;;  %v695_v43 = vshrl.u32 %v685_v40, 16  ;;  %v698_v44 = vshll.u32 %v685_v40, 16  ;;  %v711_v48 = vld [vmem:[#allocation2 + $0x74] sm:$0x1] }
  0x57   : > { %v689_v45 = vrot.slane %v687_v41, 7  ;;  %v697_v46 = vrot.slane %v695_v43, 7 }
  0x59   : > { %v692_v49 = vor.u32 %v690_v42, %v689_v45  ;;  %v693_v50 = vrot.slane %v689_v45, 4  ;;  %v700_v51 = vor.u32 %v698_v44, %v697_v46  ;;  %v702_v52 = vrot.slane %v697_v46, 4 }
  0x5b   : > { %v708_v53 = vsel %vm2911_vm5, %v692_v49, %v707_v47  ;;  %v701_v54 = vsel %vm2927_vm7, %v693_v50, %v700_v51  ;;  %v712_v55 = vsel %vm2921_vm6, %v702_v52, %v711_v48 }
  0x5c   : > { %709 = vst [vmem:[#allocation2 + $0x6c] sm:$0xf] %v708_v53 }
  0x5d   : > { %710 = vst.msk [vmem:[#allocation2 + $0x70] sm:$0xf] %vm574_vm0, %v701_v54 }
  0x5e   : > { %713 = vst [vmem:[#allocation2 + $0x74] sm:$0x1] %v712_v55 }
  0x5f PF: > { %p2541_p13 = scmp.ne.s32.totalorder %s2796_s18, 1 }
  0x61   : > { %717 = sbr.rel (%p2541_p13) target bundleno = 106 (0x6a), region = 56 }
  0x66   : > { %v719_v56 = vld [vmem:[#allocation2 + $0x6c] sm:$0xf]  ;;  %v723_v57 = vld [vmem:[#allocation2 + $0x74] sm:$0x1]  ;;  %v2815_v59 = vmov 0  }
  0x67   : > { %v720_v58 = vsel %vm2911_vm5, 0, %v719_v56  ;;  %722 = vst.msk [vmem:[#allocation2 + $0x70] sm:$0xf] %vm574_vm0, %v2815_v59  ;;  %v724_v15 = vsel %vm2921_vm6, 0, %v723_v57 }
  0x68   : > { %721 = vst [vmem:[#allocation2 + $0x6c] sm:$0xf] %v720_v58 }
  0x69   : > { %725 = vst [vmem:[#allocation2 + $0x74] sm:$0x1] %v724_v15 }
  0x6a PF: > { %vm3045_vm8 = vmand %vm582_vm4, %vm575_vm1  ;;  %v769_v61 = vld [vmem:[#allocation2 + $0x38] sm:$0x1]  ;;  %v796_v62 = vld [vmem:[#allocation2 + $0x34] sm:$0xf]  ;;  %vm1038_vm9 = vcmask 1042432   ;;  %vm1039_vm10 = vcmask 1046532  }
  0x6b   : > { %v770_v6 = vsel %vm3045_vm8, 0, %v769_v61  ;;  %v1010_v63 = vld [vmem:[#allocation2 + $0x30] sm:$0xe]  ;;  %v1071_v0 = vrot.slane %v796_v62, 5  ;;  %v920_v1 = vshll.u32 %v796_v62, 16  ;;  %v924_v3 = vshrl.u32 %v796_v62, 16  ;;  %vm3053_vm11 = vmor %vm1038_vm9, %vm1039_vm10 }
  0x6c   : > { %771 = vst [vmem:[#allocation2 + $0x38] sm:$0x1] %v770_v6  ;;  %v738_v2 = vld [vmem:[#allocation2 + $0x30] sm:$0x1]  ;;  %v2546_v4 = vrot.slane %v1010_v63, 9  ;;  %s2816_s18 = smov 8  }
  0x6d   : > { %v1073_v5 = vrot.slane %v1071_v0, 4  ;;  %v739_v7 = vsel %vm2921_vm6, 0, %v738_v2  ;;  %vm811_vm12 = vsmask.f32 3328  ;;  %v3057_v9 = vrot.slane %v920_v1, 5  ;;  %s2817_s9 = smov 12  }
  0x6e   : > { %740 = vst [vmem:[#allocation2 + $0x30] sm:$0x1] %v739_v7  ;;  %v926_v10 = vrot.slane %v924_v3, 4  ;;  %v775_v11 = vld [vmem:[#allocation2 + $0x50] sm:$0x1]  ;;  %v1072_v21 = vsel %vm3053_vm11, %v2546_v4, %v1071_v0  ;;  %s2818_s10 = smov 4  }
  0x6f   : > { %v800_v13 = vld [vmem:[#allocation2 + $0x4c] sm:$0xf]  ;;  %v1012_v14 = vld [vmem:[#allocation2 + $0x48] sm:$0xe]  ;;  %v776_v17 = vsel %vm3045_vm8, 0, %v775_v11  ;;  %v1786_v33 = vunpack.c.l.b16 %v1072_v21  ;;  %s2819_s11 = smov 16  }
  0x70   : > { %v927_v16 = vor.u32 %v926_v10, %v3057_v9  ;;  %v2548_v18 = vrot.slane %v1012_v14, 9  ;;  %v1085_v19 = vrot.slane %v800_v13, 5  ;;  %v744_v20 = vld [vmem:[#allocation2 + $0x48] sm:$0x1]  ;;  %777 = vst [vmem:[#allocation2 + $0x50] sm:$0x1] %v776_v17 }
  0x71   : > { %v745_v22 = vsel %vm2921_vm6, 0, %v744_v20  ;;  %v968_v23 = vshll.u32 %v800_v13, 16  ;;  %v972_v24 = vshrl.u32 %v800_v13, 16  ;;  %vm812_vm13 = vsmask.f32 7440  ;;  %s2820_s12 = smov 24  }
  0x72   : > { %v3068_v25 = vsel %vm3053_vm11, %v2548_v18, %v1085_v19  ;;  %746 = vst [vmem:[#allocation2 + $0x48] sm:$0x1] %v745_v22  ;;  %v747_v26 = vld [vmem:[#allocation2 + $0x54] sm:$0x1]  ;;  %v928_v28 = vrot.slane %v927_v16, 4  ;;  %vm3076_vm14 = vmor %vm811_vm12, %vm812_vm13  ;;  %v1087_v38 = vrot.slane %v1085_v19, 4 }
  0x73   : > { %v807_v27 = vld [vmem:[#allocation2 + $0x38] sm:$0x1]  ;;  %v3070_v29 = vrot.slane %v968_v23, 5  ;;  %v974_v30 = vrot.slane %v972_v24, 4  ;;  %v748_v31 = vsel %vm2921_vm6, 0, %v747_v26  ;;  %v1790_v39 = vunpack.c.l.b16 %v3068_v25  ;;  %s2821_s13 = smov 20  }
  0x74   : > { %v1074_v32 = vrot.slane %v807_v27, 5  ;;  %v930_v34 = vshll.u32 %v807_v27, 16  ;;  %749 = vst [vmem:[#allocation2 + $0x54] sm:$0x1] %v748_v31  ;;  %v778_v35 = vld [vmem:[#allocation2 + $0x5c] sm:$0x1] }
  0x75   : > { %v795_v36 = vld [vmem:[#allocation2 + $0x30] sm:$0xf]  ;;  %v975_v40 = vor.u32 %v974_v30, %v3070_v29  ;;  %v779_v41 = vsel %vm3045_vm8, 0, %v778_v35  ;;  %v3084_v42 = vld [vmem:[#allocation2 + $0x58] sm:$0xf]  ;;  %s2822_s15 = smov 28  }
  0x76   : > { %v1075_v43 = vsel %vm3053_vm11, %v1073_v5, %v1074_v32  ;;  %v911_v44 = vshrl.u32 %v795_v36, 16  ;;  %v914_v45 = vshll.u32 %v795_v36, 16  ;;  %v932_v46 = vrot.slane %v930_v34, 5  ;;  %780 = vst [vmem:[#allocation2 + $0x5c] sm:$0x1] %v779_v41  ;;  %s2823_s16 = smov 32  }
  0x77   : > { %v1787_v47 = vunpack.c.l.b16 %v1075_v43  ;;  %v976_v48 = vrot.slane %v975_v40, 4  ;;  %v1275_v49 = vshll.u32 %v3084_v42, 16  ;;  %v1279_v50 = vshrl.u32 %v3084_v42, 16  ;;  %v741_v51 = vld [vmem:[#allocation2 + $0x3c] sm:$0x1] }
  0x78   : > { %v913_v52 = vrot.slane %v911_v44, 4  ;;  %v916_v53 = vrot.slane %v914_v45, 5  ;;  %v933_v54 = vsel %vm3076_vm14, %v928_v28, %v932_v46  ;;  %v809_v55 = vld [vmem:[#allocation2 + $0x50] sm:$0x1]  ;;  %v742_v56 = vsel %vm2921_vm6, 0, %v741_v51 }
  0x79   : > { %v1798_v57 = vpack.c.b16 %v1787_v47, %v1786_v33  ;;  %v1747_v58 = vunpack.c.l.b16 %v933_v54  ;;  %v1088_v59 = vrot.slane %v809_v55, 5  ;;  %v799_v15 = vld [vmem:[#allocation2 + $0x48] sm:$0xf]  ;;  %v978_v61 = vshll.u32 %v809_v55, 16  ;;  %743 = vst [vmem:[#allocation2 + $0x3c] sm:$0x1] %v742_v56 }
  0x7a   : > { %v917_v62 = vor.u32 %v916_v53, %v913_v52  ;;  %v959_v6 = vshrl.u32 %v799_v15, 16  ;;  %v962_v63 = vshll.u32 %v799_v15, 16  ;;  %v1277_v0 = vrot.slane %v1275_v49, 5  ;;  %v772_v1 = vld [vmem:[#allocation2 + $0x44] sm:$0x1] }
  0x7b   : > { %1810 = vrot.lane.b32.xlu1 %v1798_v57, %s2816_s18  ;;  %v1089_v2 = vsel %vm3053_vm11, %v1087_v38, %v1088_v59  ;;  %v980_v3 = vrot.slane %v978_v61, 5  ;;  %v1109_v4 = vld [vmem:[#allocation2 + $0x54] sm:$0xf]  ;;  %v1281_v5 = vrot.slane %v1279_v50, 4  ;;  %v773_v7 = vsel %vm3045_vm8, 0, %v772_v1 }
  0x7c   : > { %v918_v10 = vrot.slane %v917_v62, 4  ;;  %v1791_v11 = vunpack.c.l.b16 %v1089_v2  ;;  %v961_v13 = vrot.slane %v959_v6, 4  ;;  %v964_v14 = vrot.slane %v962_v63, 5  ;;  %774 = vst [vmem:[#allocation2 + $0x44] sm:$0x1] %v773_v7  ;;  %v2702_v6 = vld [vmem:[#allocation2 + $0x54] sm:$0xff] }
  0x7d   : > { %v981_v16 = vsel %vm3076_vm14, %v976_v48, %v980_v3  ;;  %v3101_v17 = vld [vmem:[#allocation2 + $0x5c] sm:$0x1]  ;;  %v1266_v18 = vshrl.u32 %v1109_v4, 16  ;;  %v1269_v19 = vshll.u32 %v1109_v4, 16  ;;  %v1282_v20 = vor.u32 %v1281_v5, %v1277_v0  ;;  %v3103_v21 = vld [vmem:[#allocation2 + $0x40] sm:$0xf] }
  0x7e   : > { %v923_v22 = vsel %vm3076_vm14, %v918_v10, %v3057_v9  ;;  %v1800_v23 = vpack.c.b16 %v1791_v11, %v1790_v39  ;;  %v965_v24 = vor.u32 %v964_v14, %v961_v13  ;;  %v1751_v31 = vunpack.c.l.b16 %v981_v16  ;;  %v1319_v43 = vld [vmem:[#allocation2 + $0x54] sm:$0xe]  ;;  %v732_v46 = vld [vmem:[#allocation2 + $0x18] sm:$0x1]  ;;  %v763_v55 = vld [vmem:[#allocation2 + $0x20] sm:$0x1] }
  0x7f   : > { %v1746_v25 = vunpack.c.l.b16 %v923_v22  ;;  %v1268_v26 = vrot.slane %v1266_v18, 4  ;;  %v1271_v27 = vrot.slane %v1269_v19, 5  ;;  %v1283_v28 = vrot.slane %v1282_v20, 4  ;;  %v3125_v1 = vld [vmem:[#allocation2 + $0x1c] sm:$0xf] }
  0x80   : > { %v966_v30 = vrot.slane %v965_v24, 4  ;;  %v1285_v32 = vshll.u32 %v3101_v17, 16  ;;  %v2700_v33 = vld [vmem:[#allocation2 + $0x3c] sm:$0xff]  ;;  %v1227_v35 = vshll.u32 %v3103_v21, 16  ;;  %v1231_v45 = vshrl.u32 %v3103_v21, 16 }
  0x81   : > { %v1105_v34 = vld [vmem:[#allocation2 + $0x3c] sm:$0xf]  ;;  %v1758_v36 = vpack.c.b16 %v1747_v58, %v1746_v25  ;;  %v1272_v38 = vor.u32 %v1271_v27, %v1268_v26  ;;  %1858 = vrot.lane.b32.xlu2 %v2700_v33, %s2817_s9  ;;  %v2556_v54 = vrot.slane %v1319_v43, 9  ;;  %v1389_v63 = vrot.slane %v3084_v42, 5  ;;  %v726_v13 = vld [vmem:[#allocation2] sm:$0x1] }
  0x82   : > { %v1218_v40 = vshrl.u32 %v1105_v34, 16  ;;  %v1221_v41 = vshll.u32 %v1105_v34, 16  ;;  %v971_v9 = vsel %vm3076_vm14, %v966_v30, %v3070_v29  ;;  %v1287_v39 = vrot.slane %v1285_v32, 5 }
  0x83   : > { %v1229_v44 = vrot.slane %v1227_v35, 5  ;;  %1770 = vrot.lane.b32.xlu0 %v1758_v36, %s2818_s10  ;;  %1814 = vrot.lane.b32.xlu1 %v1800_v23, %s2816_s18  ;;  %v1750_v47 = vunpack.c.l.b16 %v971_v9  ;;  %v1273_v48 = vrot.slane %v1272_v38, 4  ;;  %v3117_v49 = vld [vmem:[#allocation2 + $0x44] sm:$0x1]  ;;  %v1233_v52 = vrot.slane %v1231_v45, 4 }
  0x84   : > { %v1220_v50 = vrot.slane %v1218_v40, 4  ;;  %v1223_v51 = vrot.slane %v1221_v41, 5  ;;  %v1288_v29 = vsel %vm3076_vm14, %v1283_v28, %v1287_v39  ;;  %v1237_v53 = vshll.u32 %v3117_v49, 16  ;;  %v788_v23 = vld [vmem:[#allocation2 + $0x4] sm:$0xf]  ;;  %v2708_v40 = vld [vmem:[#allocation2 + $0x48] sm:$0xff] }
  0x85   : > { %v1760_v56 = vpack.c.b16 %v1751_v31, %v1750_v47  ;;  %v1278_v57 = vsel %vm3076_vm14, %v1273_v48, %v1277_v0  ;;  %v1879_v58 = vunpack.c.l.b16 %v1288_v29  ;;  %v1234_v61 = vor.u32 %v1233_v52, %v1229_v44  ;;  %v1317_v0 = vld [vmem:[#allocation2 + $0x3c] sm:$0xe]  ;;  %v1006_v28 = vld [vmem:[#allocation2] sm:$0xe]  ;;  %v750_v39 = vld [vmem:[#allocation2 + $0x60] sm:$0x1] }
  0x86   : > { %v1224_v59 = vor.u32 %v1223_v51, %v1220_v50  ;;  %v1878_v15 = vunpack.c.l.b16 %v1278_v57  ;;  %v1239_v62 = vrot.slane %v1237_v53, 5  ;;  %v1392_v3 = vrot.slane %v3101_v17, 5  ;;  %v757_v17 = vld [vmem:[#allocation2 + $0x8] sm:$0x1] }
  0x87   : > { %v733_v4 = vsel %vm2921_vm6, 0, %v732_v46  ;;  %v764_v5 = vsel %vm3045_vm8, 0, %v763_v55  ;;  %v1235_v10 = vrot.slane %v1234_v61, 4  ;;  %v1391_v11 = vrot.slane %v1389_v63, 4 }
  0x88   : > { %v1225_v2 = vrot.slane %v1224_v59, 4  ;;  %v1888_v7 = vpack.c.b16 %v1879_v58, %v1878_v15  ;;  %734 = vst [vmem:[#allocation2 + $0x18] sm:$0x1] %v733_v4  ;;  %v872_v14 = vshll.u32 %v3125_v1, 16  ;;  %v876_v16 = vshrl.u32 %v3125_v1, 16 }
  0x89   : > { %765 = vst [vmem:[#allocation2 + $0x20] sm:$0x1] %v764_v5  ;;  %v1240_v18 = vsel %vm3076_vm14, %v1235_v10, %v1239_v62  ;;  %1862 = vrot.lane.b32.xlu2 %v2702_v6, %s2817_s9  ;;  %v1390_v19 = vsel %vm3053_vm11, %v2556_v54, %v1389_v63  ;;  %v1393_v20 = vsel %vm3053_vm11, %v1391_v11, %v1392_v3  ;;  %v2554_v22 = vrot.slane %v1317_v0, 9  ;;  %v3165_v58 = vld [vmem:[#allocation2 + $0x64] sm:$0xf] }
  0x8a   : > { %v1230_v42 = vsel %vm3076_vm14, %v1225_v2, %v1229_v44  ;;  %v1875_v25 = vunpack.c.l.b16 %v1240_v18  ;;  %v3145_v26 = vrot.slane %v872_v14, 5  ;;  %v878_v27 = vrot.slane %v876_v16, 4  ;;  %v1624_v4 = vld [vmem:[#allocation2 + $0x60] sm:$0xe] }
  0x8b   : > { %1774 = vrot.lane.b32.xlu0 %v1760_v56, %s2818_s10  ;;  %1902 = vrot.lane.b32.xlu1 %v1888_v7, %s2819_s11  ;;  %v1874_v24 = vunpack.c.l.b16 %v1230_v42  ;;  %v1375_v30 = vrot.slane %v3103_v21, 5  ;;  %v1378_v31 = vrot.slane %v3117_v49, 5  ;;  %v727_v32 = vsel %vm2921_vm6, 0, %v726_v13  ;;  %v781_v49 = vld [vmem:[#allocation2 + $0x68] sm:$0x1] }
  0x8c   : > { %v758_v33 = vsel %vm3045_vm8, 0, %v757_v17  ;;  %v1918_v34 = vunpack.c.l.b16 %v1390_v19  ;;  %v1919_v35 = vunpack.c.l.b16 %v1393_v20  ;;  %v879_v36 = vor.u32 %v878_v27, %v3145_v26  ;;  %728 = vst [vmem:[#allocation2] sm:$0x1] %v727_v32 }
  0x8d   : > { %v824_v38 = vshll.u32 %v788_v23, 16  ;;  %v1376_v41 = vsel %vm3053_vm11, %v2554_v22, %v1375_v30  ;;  %v1377_v43 = vrot.slane %v1375_v30, 4  ;;  %759 = vst [vmem:[#allocation2 + $0x8] sm:$0x1] %v758_v33  ;;  %v828_v21 = vshrl.u32 %v788_v23, 16 }
  0x8e   : > { %v2542_v9 = vrot.slane %v1006_v28, 9  ;;  %v1886_v44 = vpack.c.b16 %v1875_v25, %v1874_v24  ;;  %v1914_v46 = vunpack.c.l.b16 %v1376_v41  ;;  %v1043_v48 = vrot.slane %v788_v23, 5  ;;  %v1410_v28 = vld [vmem:[#allocation2 + $0x48] sm:$0xf] }
  0x8f   : > { %v791_v45 = vld [vmem:[#allocation2 + $0x18] sm:$0xf]  ;;  %v3156_v47 = vrot.slane %v824_v38, 5  ;;  %v1379_v52 = vsel %vm3053_vm11, %v1377_v43, %v1378_v31  ;;  %v830_v53 = vrot.slane %v828_v21, 4  ;;  %v880_v54 = vrot.slane %v879_v36, 4 }
  0x90   : > { %v3158_v50 = vld [vmem:[#allocation2 + $0x20] sm:$0x1]  ;;  %v863_v51 = vshrl.u32 %v791_v45, 16  ;;  %v866_v29 = vshll.u32 %v791_v45, 16  ;;  %v1915_v56 = vunpack.c.l.b16 %v1379_v52  ;;  %v1044_v57 = vsel %vm3053_vm11, %v2542_v9, %v1043_v48 }
  0x91   : > { %v882_v55 = vshll.u32 %v3158_v50, 16  ;;  %v831_v61 = vor.u32 %v830_v53, %v3156_v47  ;;  %v1045_v62 = vrot.slane %v1043_v48, 4  ;;  %v751_v2 = vsel %vm2921_vm6, 0, %v750_v39 }
  0x92   : > { %v865_v59 = vrot.slane %v863_v51, 4  ;;  %v868_v15 = vrot.slane %v866_v29, 5  ;;  %v1926_v63 = vpack.c.b16 %v1915_v56, %v1914_v46  ;;  %v782_v3 = vsel %vm3045_vm8, 0, %v781_v49  ;;  %752 = vst [vmem:[#allocation2 + $0x60] sm:$0x1] %v751_v2 }
  0x93   : > { %1898 = vrot.lane.b32.xlu0 %v1886_v44, %s2819_s11  ;;  %1986 = vrot.lane.b32.xlu1 %v2708_v40, %s2820_s12  ;;  %v884_v6 = vrot.slane %v882_v55, 5  ;;  %v1928_v5 = vpack.c.b16 %v1919_v35, %v1918_v34  ;;  %v787_v7 = vld [vmem:[#allocation2] sm:$0xf]  ;;  %v832_v10 = vrot.slane %v831_v61, 4  ;;  %v1580_v11 = vshll.u32 %v3165_v58, 16 }
  0x94   : > { %v869_v0 = vor.u32 %v868_v15, %v865_v59  ;;  %1938 = vrot.lane.b32.xlu2 %v1926_v63, %s2821_s13  ;;  %v803_v42 = vld [vmem:[#allocation2 + $0x8] sm:$0x1]  ;;  %v815_v14 = vshrl.u32 %v787_v7, 16  ;;  %v818_v16 = vshll.u32 %v787_v7, 16  ;;  %v1778_v17 = vunpack.c.l.b16 %v1044_v57  ;;  %783 = vst [vmem:[#allocation2 + $0x68] sm:$0x1] %v782_v3 }
  0x95   : > { %v885_v13 = vsel %vm3076_vm14, %v880_v54, %v884_v6  ;;  %v834_v20 = vshll.u32 %v803_v42, 16  ;;  %v1046_v22 = vrot.slane %v803_v42, 5  ;;  %v3178_v25 = vrot.slane %v1580_v11, 5  ;;  %v1411_v57 = vld [vmem:[#allocation2 + $0x4c] sm:$0xf] }
  0x96   : > { %v870_v18 = vrot.slane %v869_v0, 4  ;;  %v1743_v19 = vunpack.c.l.b16 %v885_v13  ;;  %v817_v23 = vrot.slane %v815_v14, 4  ;;  %v820_v24 = vrot.slane %v818_v16, 5  ;;  %v1622_v7 = vld [vmem:[#allocation2 + $0x48] sm:$0xe] }
  0x97   : > { %v1584_v27 = vshrl.u32 %v3165_v58, 16  ;;  %v836_v31 = vrot.slane %v834_v20, 5  ;;  %v1047_v32 = vsel %vm3053_vm11, %v1045_v62, %v1046_v22  ;;  %v2564_v33 = vrot.slane %v1624_v4, 9  ;;  %v1422_v62 = vld [vmem:[#allocation2 + $0x50] sm:$0x1] }
  0x98   : > { %v875_v30 = vsel %vm3076_vm14, %v870_v18, %v3145_v26  ;;  %v821_v35 = vor.u32 %v820_v24, %v817_v23  ;;  %v1779_v36 = vunpack.c.l.b16 %v1047_v32  ;;  %v1694_v41 = vrot.slane %v3165_v58, 5  ;;  %v760_v20 = vld [vmem:[#allocation2 + $0x14] sm:$0x1] }
  0x99   : > { %v1742_v34 = vunpack.c.l.b16 %v875_v30  ;;  %v1586_v38 = vrot.slane %v1584_v27, 4  ;;  %v837_v40 = vsel %vm3076_vm14, %v832_v10, %v836_v31  ;;  %v1523_v43 = vshrl.u32 %v1410_v28, 16  ;;  %v2710_v45 = vld [vmem:[#allocation2 + $0x60] sm:$0xff] }
  0x9a   : > { %v1526_v21 = vshll.u32 %v1410_v28, 16  ;;  %v822_v26 = vrot.slane %v821_v35, 4  ;;  %v1739_v39 = vunpack.c.l.b16 %v837_v40  ;;  %v1794_v44 = vpack.c.b16 %v1779_v36, %v1778_v17  ;;  %v1414_v46 = vld [vmem:[#allocation2 + $0x60] sm:$0xf]  ;;  %v3203_v28 = vld [vmem:[#allocation2 + $0x10] sm:$0xf] }
  0x9b   : > { %1942 = vrot.lane.b32.xlu0 %v1928_v5, %s2821_s13  ;;  %v1756_v9 = vpack.c.b16 %v1743_v19, %v1742_v34  ;;  %v1424_v48 = vld [vmem:[#allocation2 + $0x68] sm:$0x1]  ;;  %v1571_v49 = vshrl.u32 %v1414_v46, 16  ;;  %v1574_v51 = vshll.u32 %v1414_v46, 16  ;;  %v1587_v29 = vor.u32 %v1586_v38, %v3178_v25  ;;  %v729_v19 = vld [vmem:[#allocation2 + $0xc] sm:$0x1] }
  0x9c   : > { %v1695_v52 = vsel %vm3053_vm11, %v2564_v33, %v1694_v41  ;;  %v827_v53 = vsel %vm3076_vm14, %v822_v26, %v3156_v47  ;;  %1990 = vrot.lane.b32.xlu2 %v2710_v45, %s2820_s12  ;;  %v1590_v54 = vshll.u32 %v1424_v48, 16  ;;  %v1696_v55 = vrot.slane %v1694_v41, 4  ;;  %v1008_v40 = vld [vmem:[#allocation2 + $0x18] sm:$0xe]  ;;  %v735_v46 = vld [vmem:[#allocation2 + $0x24] sm:$0x1] }
  0x9d   : > { %1766 = vrot.lane.b32.xlu1 %v1756_v9, %s2818_s10  ;;  %v1697_v56 = vrot.slane %v1424_v48, 5  ;;  %v1738_v58 = vunpack.c.l.b16 %v827_v53  ;;  %v1573_v59 = vrot.slane %v1571_v49, 4  ;;  %v1576_v15 = vrot.slane %v1574_v51, 5  ;;  %v766_v9 = vld [vmem:[#allocation2 + $0x2c] sm:$0x1] }
  0x9e   : > { %v1588_v61 = vrot.slane %v1587_v29, 4  ;;  %v1592_v6 = vrot.slane %v1590_v54, 5  ;;  %v2046_v2 = vunpack.c.l.b16 %v1695_v52  ;;  %v1525_v3 = vrot.slane %v1523_v43, 4  ;;  %v1315_v52 = vld [vmem:[#allocation2 + $0x24] sm:$0xe] }
  0x9f   : > { %v1698_v63 = vsel %vm3053_vm11, %v1696_v55, %v1697_v56  ;;  %v1754_v4 = vpack.c.b16 %v1739_v39, %v1738_v58  ;;  %v1577_v5 = vor.u32 %v1576_v15, %v1573_v59  ;;  %v1528_v0 = vrot.slane %v1526_v21, 5 }
  0xa0   : > { %v2047_v47 = vunpack.c.l.b16 %v1698_v63  ;;  %v1593_v10 = vsel %vm3076_vm14, %v1588_v61, %v1592_v6  ;;  %v1532_v11 = vshll.u32 %v1411_v57, 16  ;;  %v1536_v13 = vshrl.u32 %v1411_v57, 16  ;;  %v1402_v63 = vld [vmem:[#allocation2 + $0x18] sm:$0xf] }
  0xa1   : > { %v1542_v42 = vshll.u32 %v1422_v62, 16  ;;  %v1578_v14 = vrot.slane %v1577_v5, 4  ;;  %v2007_v16 = vunpack.c.l.b16 %v1593_v10  ;;  %v1529_v18 = vor.u32 %v1528_v0, %v1525_v3 }
  0xa2   : > { %v2056_v17 = vpack.c.b16 %v2047_v47, %v2046_v2  ;;  %v1534_v22 = vrot.slane %v1532_v11, 5  ;;  %v1538_v23 = vrot.slane %v1536_v13, 4  ;;  %v2562_v27 = vrot.slane %v1622_v7, 9 }
  0xa3   : > { %1762 = vrot.lane.b32.xlu0 %v1754_v4, %s2818_s10  ;;  %v1544_v24 = vrot.slane %v1542_v42, 5  ;;  %v1583_v30 = vsel %vm3076_vm14, %v1578_v14, %v3178_v25  ;;  %v1530_v31 = vrot.slane %v1529_v18, 4  ;;  %v1680_v32 = vrot.slane %v1411_v57, 5  ;;  %v3227_v57 = vld [vmem:[#allocation2 + $0x28] sm:$0xf] }
  0xa4   : > { %v1683_v33 = vrot.slane %v1422_v62, 5  ;;  %v2006_v34 = vunpack.c.l.b16 %v1583_v30  ;;  %v1539_v35 = vor.u32 %v1538_v23, %v1534_v22  ;;  %v730_v36 = vsel %vm2921_vm6, 0, %v729_v19  ;;  %v1313_v62 = vld [vmem:[#allocation2 + $0xc] sm:$0xe]  ;;  %v3247_v23 = vld [vmem:[#allocation2 + $0x1c] sm:$0xf] }
  0xa5   : > { %1802 = vrot.lane.b32.xlu1 %v1794_v44, %s2816_s18  ;;  %v761_v38 = vsel %vm3045_vm8, 0, %v760_v20  ;;  %v1535_v41 = vsel %vm3076_vm14, %v1530_v31, %v1534_v22  ;;  %v1681_v25 = vsel %vm3053_vm11, %v2562_v27, %v1680_v32  ;;  %v1682_v43 = vrot.slane %v1680_v32, 4  ;;  %731 = vst [vmem:[#allocation2 + $0xc] sm:$0x1] %v730_v36  ;;  %v3251_v31 = vld [vmem:[#allocation2 + $0x20] sm:$0x1] }
  0xa6   : > { %v1131_v21 = vshll.u32 %v3203_v28, 16  ;;  %v2016_v26 = vpack.c.b16 %v2007_v16, %v2006_v34  ;;  %v1540_v39 = vrot.slane %v1539_v35, 4  ;;  %v2002_v44 = vunpack.c.l.b16 %v1535_v41  ;;  %762 = vst [vmem:[#allocation2 + $0x14] sm:$0x1] %v761_v38 }
  0xa7   : > { %v2042_v45 = vunpack.c.l.b16 %v1681_v25  ;;  %v1684_v48 = vsel %vm3053_vm11, %v1682_v43, %v1683_v33  ;;  %v1135_v51 = vshrl.u32 %v3203_v28, 16  ;;  %v2544_v29 = vrot.slane %v1008_v40, 9 }
  0xa8   : > { %v3220_v49 = vrot.slane %v1131_v21, 5  ;;  %v1545_v53 = vsel %vm3076_vm14, %v1540_v39, %v1544_v24  ;;  %v2043_v54 = vunpack.c.l.b16 %v1684_v48  ;;  %v1057_v55 = vrot.slane %v3125_v1, 5 }
  0xa9   : > { %v1060_v56 = vrot.slane %v3158_v50, 5  ;;  %v2003_v58 = vunpack.c.l.b16 %v1545_v53  ;;  %v1137_v59 = vrot.slane %v1135_v51, 4  ;;  %v736_v15 = vsel %vm2921_vm6, 0, %v735_v46 }
  0xaa   : > { %v767_v61 = vsel %vm3045_vm8, 0, %v766_v9  ;;  %v1058_v6 = vsel %vm3053_vm11, %v2544_v29, %v1057_v55  ;;  %v1059_v1 = vrot.slane %v1057_v55, 4  ;;  %737 = vst [vmem:[#allocation2 + $0x24] sm:$0x1] %v736_v15  ;;  %v2552_v50 = vrot.slane %v1315_v52, 9 }
  0xab   : > { %2030 = vrot.lane.b32.xlu0 %v2016_v26, %s2822_s15  ;;  %v2014_v2 = vpack.c.b16 %v2003_v58, %v2002_v44  ;;  %v1138_v3 = vor.u32 %v1137_v59, %v3220_v49  ;;  %v1782_v4 = vunpack.c.l.b16 %v1058_v6  ;;  %768 = vst [vmem:[#allocation2 + $0x2c] sm:$0x1] %v767_v61  ;;  %v1361_v5 = vrot.slane %v3227_v57, 5 }
  0xac   : > { %v2054_v47 = vpack.c.b16 %v2043_v54, %v2042_v45  ;;  %v1097_v0 = vld [vmem:[#allocation2 + $0xc] sm:$0xf]  ;;  %v1061_v7 = vsel %vm3053_vm11, %v1059_v1, %v1060_v56  ;;  %v2550_v10 = vrot.slane %v1313_v62, 9  ;;  %v1347_v11 = vrot.slane %v3203_v28, 5  ;;  %v3268_v1 = vld [vmem:[#allocation2 + $0x34] sm:$0xf] }
  0xad   : > { %2070 = vrot.lane.b32.xlu1 %v2056_v17, %s2823_s16  ;;  %2026 = vrot.lane.b32.xlu2 %v2014_v2, %s2822_s15  ;;  %v1113_v13 = vld [vmem:[#allocation2 + $0x14] sm:$0x1]  ;;  %v1122_v42 = vshrl.u32 %v1097_v0, 16  ;;  %v1125_v14 = vshll.u32 %v1097_v0, 16  ;;  %v1783_v16 = vunpack.c.l.b16 %v1061_v7  ;;  %v1427_v18 = vshrl.u32 %v1402_v63, 16  ;;  %v2696_v7 = vld [vmem:[#allocation2 + $0xc] sm:$0xff] }
  0xae   : > { %v1139_v19 = vrot.slane %v1138_v3, 4  ;;  %v1141_v20 = vshll.u32 %v1113_v13, 16  ;;  %v3245_v17 = vsel %vm3053_vm11, %v2552_v50, %v1361_v5  ;;  %v1363_v22 = vrot.slane %v1361_v5, 4  ;;  %v1620_v3 = vld [vmem:[#allocation2 + $0x30] sm:$0xe] }
  0xaf   : > { %v1124_v24 = vrot.slane %v1122_v42, 4  ;;  %v1127_v27 = vrot.slane %v1125_v14, 5  ;;  %v1796_v30 = vpack.c.b16 %v1783_v16, %v1782_v4  ;;  %v1348_v28 = vsel %vm3053_vm11, %v2550_v10, %v1347_v11  ;;  %v3272_v0 = vld [vmem:[#allocation2 + $0x38] sm:$0x1] }
  0xb0   : > { %v1143_v32 = vrot.slane %v1141_v20, 5  ;;  %v1910_v33 = vunpack.c.l.b16 %v3245_v17  ;;  %v1349_v34 = vrot.slane %v1347_v11, 4  ;;  %v1350_v35 = vrot.slane %v1113_v13, 5 }
  0xb1   : > { %v1128_v36 = vor.u32 %v1127_v27, %v1124_v24  ;;  %v1429_v38 = vrot.slane %v1427_v18, 4  ;;  %v1430_v40 = vshll.u32 %v1402_v63, 16  ;;  %v1436_v41 = vshll.u32 %v3247_v23, 16  ;;  %v1101_v39 = vld [vmem:[#allocation2 + $0x24] sm:$0xf] }
  0xb2   : > { %v1144_v25 = vsel %vm3076_vm14, %v1139_v19, %v1143_v32  ;;  %v1115_v43 = vld [vmem:[#allocation2 + $0x2c] sm:$0x1]  ;;  %v1351_v21 = vsel %vm3053_vm11, %v1349_v34, %v1350_v35  ;;  %v1440_v9 = vshrl.u32 %v3247_v23, 16  ;;  %v1446_v26 = vshll.u32 %v3251_v31, 16  ;;  %v2698_v15 = vld [vmem:[#allocation2 + $0x24] sm:$0xff] }
  0xb3   : > { %2066 = vrot.lane.b32.xlu0 %v2054_v47, %s2823_s16  ;;  %v1129_v44 = vrot.slane %v1128_v36, 4  ;;  %v1867_v45 = vunpack.c.l.b16 %v1144_v25  ;;  %v1364_v46 = vrot.slane %v1115_v43, 5  ;;  %v1906_v48 = vunpack.c.l.b16 %v1348_v28  ;;  %v1618_v24 = vld [vmem:[#allocation2 + $0x18] sm:$0xe]  ;;  %v1011_v34 = vld [vmem:[#allocation2 + $0x3c] sm:$0xe] }
  0xb4   : > { %v1907_v51 = vunpack.c.l.b16 %v1351_v21  ;;  %v1432_v29 = vrot.slane %v1430_v40, 5  ;;  %v1438_v52 = vrot.slane %v1436_v41, 5  ;;  %v1442_v53 = vrot.slane %v1440_v9, 4  ;;  %v3289_v40 = vld [vmem:[#allocation2 + $0x40] sm:$0xf] }
  0xb5   : > { %v1134_v54 = vsel %vm3076_vm14, %v1129_v44, %v3220_v49  ;;  %1806 = vrot.lane.b32.xlu2 %v1796_v30, %s2816_s18  ;;  %v1365_v55 = vsel %vm3053_vm11, %v1363_v22, %v1364_v46  ;;  %v1448_v56 = vrot.slane %v1446_v26, 5  ;;  %v1170_v58 = vshrl.u32 %v1101_v39, 16  ;;  %v3295_v9 = vld [vmem:[#allocation2 + $0x44] sm:$0x1]  ;;  %v1406_v46 = vld [vmem:[#allocation2 + $0x30] sm:$0xf] }
  0xb6   : > { %v1866_v59 = vunpack.c.l.b16 %v1134_v54  ;;  %v1911_v61 = vunpack.c.l.b16 %v1365_v55  ;;  %v1433_v62 = vor.u32 %v1432_v29, %v1429_v38  ;;  %v1443_v6 = vor.u32 %v1442_v53, %v1438_v52 }
  0xb7   : > { %v1172_v50 = vrot.slane %v1170_v58, 4  ;;  %v1173_v63 = vshll.u32 %v1101_v39, 16  ;;  %v1179_v2 = vshll.u32 %v3227_v57, 16  ;;  %v1183_v49 = vshrl.u32 %v3227_v57, 16 }
  0xb8   : > { %v1882_v4 = vpack.c.b16 %v1867_v45, %v1866_v59  ;;  %v1434_v5 = vrot.slane %v1433_v62, 4  ;;  %v1444_v47 = vrot.slane %v1443_v6, 4  ;;  %v1189_v42 = vshll.u32 %v1115_v43, 16 }
  0xb9   : > { %v1175_v10 = vrot.slane %v1173_v63, 5  ;;  %v1181_v11 = vrot.slane %v1179_v2, 5  ;;  %v1185_v13 = vrot.slane %v1183_v49, 4  ;;  %v2560_v16 = vrot.slane %v1620_v3, 9 }
  0xba   : > { %1890 = vrot.lane.b32.xlu1 %v1882_v4, %s2819_s11  ;;  %v1439_v14 = vsel %vm3076_vm14, %v1434_v5, %v1438_v52  ;;  %v1449_v57 = vsel %vm3076_vm14, %v1444_v47, %v1448_v56  ;;  %v1666_v18 = vrot.slane %v3268_v1, 5  ;;  %v1924_v19 = vpack.c.b16 %v1911_v61, %v1910_v33  ;;  %v3317_v4 = vld [vmem:[#allocation2 + $0x58] sm:$0xf] }
  0xbb   : > { %1854 = vrot.lane.b32.xlu0 %v2698_v15, %s2817_s9  ;;  %v1922_v20 = vpack.c.b16 %v1907_v51, %v1906_v48  ;;  %v1176_v17 = vor.u32 %v1175_v10, %v1172_v50  ;;  %v1186_v22 = vor.u32 %v1185_v13, %v1181_v11  ;;  %v1191_v27 = vrot.slane %v1189_v42, 5  ;;  %v801_v50 = vld [vmem:[#allocation2 + $0x54] sm:$0xf] }
  0xbc   : > { %v1667_v30 = vsel %vm3053_vm11, %v2560_v16, %v1666_v18  ;;  %v1668_v28 = vrot.slane %v1666_v18, 4  ;;  %v1669_v32 = vrot.slane %v3272_v0, 5  ;;  %v3285_v35 = vunpack.c.l.b16 %v1439_v14 }
  0xbd   : > { %1850 = vrot.lane.b32.xlu2 %v2696_v7, %s2817_s9  ;;  %v3287_v36 = vunpack.c.l.b16 %v1449_v57  ;;  %v1177_v38 = vrot.slane %v1176_v17, 4  ;;  %v1187_v33 = vrot.slane %v1186_v22, 4  ;;  %v2558_v25 = vrot.slane %v1618_v24, 9  ;;  %v3322_v57 = vld [vmem:[#allocation2 + $0x5c] sm:$0x1] }
  0xbe   : > { %v1670_v41 = vsel %vm3053_vm11, %v1668_v28, %v1669_v32  ;;  %v1652_v43 = vrot.slane %v3247_v23, 5  ;;  %v1655_v21 = vrot.slane %v3251_v31, 5  ;;  %v2038_v44 = vunpack.c.l.b16 %v1667_v30  ;;  %v797_v17 = vld [vmem:[#allocation2 + $0x3c] sm:$0xf] }
  0xbf   : > { %v1182_v26 = vsel %vm3076_vm14, %v1177_v38, %v1181_v11  ;;  %v1192_v39 = vsel %vm3076_vm14, %v1187_v33, %v1191_v27  ;;  %v2547_v45 = vrot.slane %v1011_v34, 9  ;;  %v2039_v23 = vunpack.c.l.b16 %v1670_v41  ;;  %v2706_v11 = vld [vmem:[#allocation2 + $0x30] sm:$0xff]  ;;  %v2704_v30 = vld [vmem:[#allocation2 + $0x18] sm:$0xff] }
  0xc0   : > { %v1870_v48 = vunpack.c.l.b16 %v1182_v26  ;;  %v1871_v51 = vunpack.c.l.b16 %v1192_v39  ;;  %v1653_v29 = vsel %vm3053_vm11, %v2558_v25, %v1652_v43  ;;  %v1654_v52 = vrot.slane %v1652_v43, 4 }
  0xc1   : > { %v2034_v53 = vunpack.c.l.b16 %v1653_v29  ;;  %v1078_v31 = vrot.slane %v3289_v40, 5  ;;  %v1081_v54 = vrot.slane %v3295_v9, 5  ;;  %v1475_v58 = vshrl.u32 %v1406_v46, 16 }
  0xc2   : > { %1934 = vrot.lane.b32.xlu1 %v1924_v19, %s2821_s13  ;;  %v1884_v55 = vpack.c.b16 %v1871_v51, %v1870_v48  ;;  %v1656_v56 = vsel %vm3053_vm11, %v1654_v52, %v1655_v21  ;;  %v1478_v59 = vshll.u32 %v1406_v46, 16  ;;  %v1484_v6 = vshll.u32 %v3268_v1, 16  ;;  %v1318_v48 = vld [vmem:[#allocation2 + $0x48] sm:$0xe] }
  0xc3   : > { %1930 = vrot.lane.b32.xlu0 %v1922_v20, %s2821_s13  ;;  %v2035_v15 = vunpack.c.l.b16 %v1656_v56  ;;  %v3311_v61 = vsel %vm3053_vm11, %v2547_v45, %v1078_v31  ;;  %v1080_v62 = vrot.slane %v1078_v31, 4  ;;  %v2010_v63 = vpack.c.b16 %v3287_v36, %v3285_v35 }
  0xc4   : > { %v1477_v2 = vrot.slane %v1475_v58, 4  ;;  %v1480_v49 = vrot.slane %v1478_v59, 5  ;;  %v1488_v3 = vshrl.u32 %v3268_v1, 16  ;;  %v2052_v5 = vpack.c.b16 %v2039_v23, %v2038_v44  ;;  %v3341_v58 = vld [vmem:[#allocation2 + $0x50] sm:$0x1] }
  0xc5   : > { %1894 = vrot.lane.b32.xlu2 %v1884_v55, %s2819_s11  ;;  %v1788_v47 = vunpack.c.l.b16 %v3311_v61  ;;  %v1486_v7 = vrot.slane %v1484_v6, 5  ;;  %v1494_v10 = vshll.u32 %v3272_v0, 16  ;;  %v2050_v13 = vpack.c.b16 %v2035_v15, %v2034_v53  ;;  %v3338_v53 = vld [vmem:[#allocation2 + $0x4c] sm:$0xf]  ;;  %v1013_v59 = vld [vmem:[#allocation2 + $0x54] sm:$0xe] }
  0xc6   : > { %v1481_v42 = vor.u32 %v1480_v49, %v1477_v2  ;;  %v1490_v14 = vrot.slane %v1488_v3, 4  ;;  %v983_v16 = vshrl.u32 %v801_v50, 16  ;;  %v1082_v1 = vsel %vm3053_vm11, %v1080_v62, %v1081_v54 }
  0xc7   : > { %v986_v18 = vshll.u32 %v801_v50, 16  ;;  %v992_v19 = vshll.u32 %v3317_v4, 16  ;;  %v996_v20 = vshrl.u32 %v3317_v4, 16  ;;  %v1496_v27 = vrot.slane %v1494_v10, 5  ;;  %v1111_v10 = vld [vmem:[#allocation2 + $0x60] sm:$0xf] }
  0xc8   : > { %v1482_v22 = vrot.slane %v1481_v42, 4  ;;  %v1491_v24 = vor.u32 %v1490_v14, %v1486_v7  ;;  %v985_v0 = vrot.slane %v983_v16, 4  ;;  %v1002_v35 = vshll.u32 %v3322_v57, 16 }
  0xc9   : > { %v988_v28 = vrot.slane %v986_v18, 5  ;;  %v994_v32 = vrot.slane %v992_v19, 5  ;;  %v998_v34 = vrot.slane %v996_v20, 4  ;;  %v935_v33 = vshrl.u32 %v797_v17, 16 }
  0xca   : > { %2018 = vrot.lane.b32.xlu1 %v2010_v63, %s2822_s15  ;;  %v1487_v36 = vsel %vm3076_vm14, %v1482_v22, %v1486_v7  ;;  %v1492_v38 = vrot.slane %v1491_v24, 4  ;;  %v938_v41 = vshll.u32 %v797_v17, 16  ;;  %v1004_v26 = vrot.slane %v1002_v35, 5  ;;  %v3363_v22 = vld [vmem:[#allocation2 + $0x64] sm:$0xf] }
  0xcb   : > { %1982 = vrot.lane.b32.xlu0 %v2706_v11, %s2820_s12  ;;  %v1998_v25 = vunpack.c.l.b16 %v1487_v36  ;;  %v989_v43 = vor.u32 %v988_v28, %v985_v0  ;;  %v999_v21 = vor.u32 %v998_v34, %v994_v32  ;;  %v937_v44 = vrot.slane %v935_v33, 4 }
  0xcc   : > { %v1497_v39 = vsel %vm3076_vm14, %v1492_v38, %v1496_v27  ;;  %v940_v45 = vrot.slane %v938_v41, 5  ;;  %v944_v46 = vshll.u32 %v3289_v40, 16  ;;  %v948_v23 = vshrl.u32 %v3289_v40, 16  ;;  %v3370_v27 = vld [vmem:[#allocation2 + $0x68] sm:$0x1] }
  0xcd   : > { %1978 = vrot.lane.b32.xlu2 %v2704_v30, %s2820_s12  ;;  %v1999_v51 = vunpack.c.l.b16 %v1497_v39  ;;  %v990_v29 = vrot.slane %v989_v43, 4  ;;  %v1000_v52 = vrot.slane %v999_v21, 4  ;;  %v1789_v31 = vunpack.c.l.b16 %v1082_v1  ;;  %v753_v30 = vld [vmem:[#allocation2 + $0x6c] sm:$0x1]  ;;  %v1107_v41 = vld [vmem:[#allocation2 + $0x48] sm:$0xf] }
  0xce   : > { %v941_v54 = vor.u32 %v940_v45, %v937_v44  ;;  %v946_v55 = vrot.slane %v944_v46, 5  ;;  %v954_v56 = vshll.u32 %v3295_v9, 16  ;;  %v950_v6 = vrot.slane %v948_v23, 4 }
  0xcf   : > { %v995_v15 = vsel %vm3076_vm14, %v990_v29, %v994_v32  ;;  %v1005_v62 = vsel %vm3076_vm14, %v1000_v52, %v1004_v26  ;;  %v2555_v50 = vrot.slane %v1318_v48, 9  ;;  %v2012_v63 = vpack.c.b16 %v1999_v51, %v1998_v25 }
  0xd0   : > { %v942_v40 = vrot.slane %v941_v54, 4  ;;  %v956_v2 = vrot.slane %v954_v56, 5  ;;  %v951_v49 = vor.u32 %v950_v6, %v946_v55  ;;  %v1382_v3 = vrot.slane %v3338_v53, 5  ;;  %v3385_v6 = vld [vmem:[#allocation2 + $0x58] sm:$0xf] }
  0xd1   : > { %v1385_v7 = vrot.slane %v3341_v58, 5  ;;  %v2549_v9 = vrot.slane %v1013_v59, 9  ;;  %v1752_v11 = vunpack.c.l.b16 %v995_v15  ;;  %v1753_v42 = vunpack.c.l.b16 %v1005_v62 }
  0xd2   : > { %2062 = vrot.lane.b32.xlu1 %v2052_v5, %s2823_s16  ;;  %v947_v14 = vsel %vm3076_vm14, %v942_v40, %v946_v55  ;;  %v1092_v16 = vrot.slane %v3317_v4, 5  ;;  %v1799_v1 = vpack.c.b16 %v1789_v31, %v1788_v47  ;;  %v952_v18 = vrot.slane %v951_v49, 4  ;;  %v1412_v55 = vld [vmem:[#allocation2 + $0x54] sm:$0xf]  ;;  %v2701_v49 = vld [vmem:[#allocation2 + $0x48] sm:$0xff] }
  0xd3   : > { %2058 = vrot.lane.b32.xlu0 %v2050_v13, %s2823_s16  ;;  %v1383_v19 = vsel %vm3053_vm11, %v2555_v50, %v1382_v3  ;;  %v1384_v20 = vrot.slane %v1382_v3, 4  ;;  %v1095_v17 = vrot.slane %v3322_v57, 5  ;;  %v1290_v24 = vshrl.u32 %v1111_v10, 16 }
  0xd4   : > { %v3360_v5 = vsel %vm3053_vm11, %v2549_v9, %v1092_v16  ;;  %v1094_v13 = vrot.slane %v1092_v16, 4  ;;  %v957_v61 = vsel %vm3076_vm14, %v952_v18, %v956_v2  ;;  %v1748_v4 = vunpack.c.l.b16 %v947_v14  ;;  %v2703_v2 = vld [vmem:[#allocation2 + $0x60] sm:$0xff] }
  0xd5   : > { %2022 = vrot.lane.b32.xlu2 %v2012_v63, %s2822_s15  ;;  %v1386_v47 = vsel %vm3053_vm11, %v1384_v20, %v1385_v7  ;;  %v1293_v0 = vshll.u32 %v1111_v10, 16  ;;  %v1761_v28 = vpack.c.b16 %v1753_v42, %v1752_v11  ;;  %v1749_v32 = vunpack.c.l.b16 %v957_v61  ;;  %v3394_v42 = vld [vmem:[#allocation2 + $0x5c] sm:$0x1] }
  0xd6   : > { %v1916_v34 = vunpack.c.l.b16 %v1383_v19  ;;  %v1292_v57 = vrot.slane %v1290_v24, 4  ;;  %v1792_v35 = vunpack.c.l.b16 %v3360_v5  ;;  %v1299_v38 = vshll.u32 %v3363_v22, 16  ;;  %v1320_v5 = vld [vmem:[#allocation2 + $0x60] sm:$0xe] }
  0xd7   : > { %v1295_v36 = vrot.slane %v1293_v0, 5  ;;  %v1303_v33 = vshrl.u32 %v3363_v22, 16  ;;  %v1917_v25 = vunpack.c.l.b16 %v1386_v47  ;;  %v1096_v43 = vsel %vm3053_vm11, %v1094_v13, %v1095_v17 }
  0xd8   : > { %v1309_v21 = vshll.u32 %v3370_v27, 16  ;;  %v754_v26 = vsel %vm2921_vm6, 0, %v753_v30  ;;  %v1759_v39 = vpack.c.b16 %v1749_v32, %v1748_v4  ;;  %v1301_v45 = vrot.slane %v1299_v38, 5  ;;  %v3403_v32 = vld [vmem:[#allocation2 + $0x28] sm:$0xf] }
  0xd9   : > { %v1296_v44 = vor.u32 %v1295_v36, %v1292_v57  ;;  %v1305_v46 = vrot.slane %v1303_v33, 4  ;;  %755 = vst [vmem:[#allocation2 + $0x6c] sm:$0x1] %v754_v26  ;;  %v1242_v51 = vshrl.u32 %v1107_v41, 16  ;;  %v1245_v29 = vshll.u32 %v1107_v41, 16 }
  0xda   : > { %1812 = vrot.lane.b32.xlu1 %v1799_v1, %s2816_s18  ;;  %v1311_v48 = vrot.slane %v1309_v21, 5  ;;  %v1251_v52 = vshll.u32 %v3338_v53, 16  ;;  %v1255_v54 = vshrl.u32 %v3338_v53, 16  ;;  %v1261_v12 = vshll.u32 %v3341_v58, 16 }
  0xdb   : > { %1776 = vrot.lane.b32.xlu0 %v1761_v28, %s2818_s10  ;;  %v1297_v23 = vrot.slane %v1296_v44, 4  ;;  %v1306_v31 = vor.u32 %v1305_v46, %v1301_v45  ;;  %v1793_v56 = vunpack.c.l.b16 %v1096_v43  ;;  %v1244_v59 = vrot.slane %v1242_v51, 4  ;;  %v3390_v9 = vpop.permute.xlu2 %1858  ;;  %v793_v28 = vld [vmem:[#allocation2 + $0x24] sm:$0xf]  ;;  %v3411_v51 = vld [vmem:[#allocation2 + $0x2c] sm:$0x1] }
  0xdc   : > { %v1247_v15 = vrot.slane %v1245_v29, 5  ;;  %v1253_v62 = vrot.slane %v1251_v52, 5  ;;  %v1927_v50 = vpack.c.b16 %v1917_v25, %v1916_v34  ;;  %v1257_v40 = vrot.slane %v1255_v54, 4 }
  0xdd   : > { %1772 = vrot.lane.b32.xlu2 %v1759_v39, %s2818_s10  ;;  %v1307_v63 = vrot.slane %v1306_v31, 4  ;;  %v1302_v3 = vsel %vm3076_vm14, %v1297_v23, %v1301_v45  ;;  %v1263_v7 = vrot.slane %v1261_v12, 5  ;;  %v1547_v58 = vshrl.u32 %v1412_v55, 16 }
  0xde   : > { %v1248_v53 = vor.u32 %v1247_v15, %v1244_v59  ;;  %v1258_v11 = vor.u32 %v1257_v40, %v1253_v62  ;;  %v1550_v14 = vshll.u32 %v1412_v55, 16  ;;  %v1556_v16 = vshll.u32 %v3385_v6, 16  ;;  %v789_v59 = vld [vmem:[#allocation2 + $0xc] sm:$0xf] }
  0xdf   : > { %v1312_v10 = vsel %vm3076_vm14, %v1307_v63, %v1311_v48  ;;  %v1801_v1 = vpack.c.b16 %v1793_v56, %v1792_v35  ;;  %v1549_v19 = vrot.slane %v1547_v58, 4  ;;  %v1560_v20 = vshrl.u32 %v3385_v6, 16 }
  0xe0   : > { %v1249_v18 = vrot.slane %v1248_v53, 4  ;;  %v1880_v13 = vunpack.c.l.b16 %v1302_v3  ;;  %v1259_v17 = vrot.slane %v1258_v11, 4  ;;  %v1552_v24 = vrot.slane %v1550_v14, 5  ;;  %v790_v3 = vld [vmem:[#allocation2 + $0x10] sm:$0xf] }
  0xe1   : > { %v1558_v61 = vrot.slane %v1556_v16, 5  ;;  %v1881_v4 = vunpack.c.l.b16 %v1312_v10  ;;  %v1562_v0 = vrot.slane %v1560_v20, 4  ;;  %v1566_v30 = vshll.u32 %v3394_v42, 16  ;;  %v2709_v20 = vld [vmem:[#allocation2 + $0x54] sm:$0xff] }
  0xe2   : > { %1864 = vrot.lane.b32.xlu1 %v2703_v2, %s2817_s9  ;;  %v1254_v47 = vsel %vm3076_vm14, %v1249_v18, %v1253_v62  ;;  %v1264_v34 = vsel %vm3076_vm14, %v1259_v17, %v1263_v7  ;;  %v1553_v35 = vor.u32 %v1552_v24, %v1549_v19  ;;  %v2557_v36 = vrot.slane %v1320_v5, 9  ;;  %v2711_v19 = vld [vmem:[#allocation2 + $0x6c] sm:$0xff] }
  0xe3   : > { %1860 = vrot.lane.b32.xlu0 %v2701_v49, %s2817_s9  ;;  %v1876_v57 = vunpack.c.l.b16 %v1254_v47  ;;  %v1877_v38 = vunpack.c.l.b16 %v1264_v34  ;;  %v1563_v33 = vor.u32 %v1562_v0, %v1558_v61  ;;  %v1396_v41 = vrot.slane %v3363_v22, 5  ;;  %v3417_v31 = vpop.permute.xlu2 %1862  ;;  %v1009_v49 = vld [vmem:[#allocation2 + $0x24] sm:$0xe] }
  0xe4   : > { %v1399_v25 = vrot.slane %v3370_v27, 5  ;;  %v1554_v43 = vrot.slane %v1553_v35, 4  ;;  %v887_v21 = vshrl.u32 %v793_v28, 16  ;;  %v890_v26 = vshll.u32 %v793_v28, 16  ;;  %v784_v35 = vld [vmem:[#allocation2 + $0x74] sm:$0x1] }
  0xe5   : > { %1816 = vrot.lane.b32.xlu2 %v1801_v1, %s2816_s18  ;;  %v896_v39 = vshll.u32 %v3403_v32, 16  ;;  %v1889_v44 = vpack.c.b16 %v1881_v4, %v1880_v13  ;;  %v1564_v45 = vrot.slane %v1563_v33, 4  ;;  %v1568_v46 = vrot.slane %v1566_v30, 5  ;;  %v804_v1 = vld [vmem:[#allocation2 + $0x14] sm:$0x1] }
  0xe6   : > { %v1398_v48 = vrot.slane %v1396_v41, 4  ;;  %v889_v29 = vrot.slane %v887_v21, 4  ;;  %v892_v52 = vrot.slane %v890_v26, 5  ;;  %v1887_v23 = vpack.c.b16 %v1877_v38, %v1876_v57  ;;  %v1007_v30 = vld [vmem:[#allocation2 + $0xc] sm:$0xe] }
  0xe7   : > { %v1559_v22 = vsel %vm3076_vm14, %v1554_v43, %v1558_v61  ;;  %v1397_v27 = vsel %vm3053_vm11, %v2557_v36, %v1396_v41  ;;  %v898_v55 = vrot.slane %v896_v39, 5  ;;  %v900_v56 = vshrl.u32 %v3403_v32, 16 }
  0xe8   : > { %v1400_v54 = vsel %vm3053_vm11, %v1398_v48, %v1399_v25  ;;  %v893_v12 = vor.u32 %v892_v52, %v889_v29  ;;  %v1569_v15 = vsel %vm3076_vm14, %v1564_v45, %v1568_v46  ;;  %v906_v62 = vshll.u32 %v3411_v51, 16  ;;  %v1416_v25 = vld [vmem:[#allocation2 + $0x6c] sm:$0xf] }
  0xe9   : > { %v1920_v63 = vunpack.c.l.b16 %v1397_v27  ;;  %v902_v2 = vrot.slane %v900_v56, 4  ;;  %v3429_v7 = vunpack.c.l.b16 %v1559_v22  ;;  %v1921_v58 = vunpack.c.l.b16 %v1400_v54  ;;  %v1417_v56 = vld [vmem:[#allocation2 + $0x70] sm:$0xf] }
  0xea   : > { %1940 = vrot.lane.b32.xlu1 %v1927_v50, %s2821_s13  ;;  %v894_v40 = vrot.slane %v893_v12, 4  ;;  %v1064_v10 = vrot.slane %v3403_v32, 5  ;;  %v839_v50 = vshrl.u32 %v789_v59, 16  ;;  %v3433_v11 = vunpack.c.l.b16 %v1569_v15 }
  0xeb   : > { %1904 = vrot.lane.b32.xlu0 %v1889_v44, %s2819_s11  ;;  %v903_v14 = vor.u32 %v902_v2, %v898_v55  ;;  %v908_v16 = vrot.slane %v906_v62, 5  ;;  %v842_v18 = vshll.u32 %v789_v59, 16  ;;  %v2545_v13 = vrot.slane %v1009_v49, 9 }
  0xec   : > { %v899_v5 = vsel %vm3076_vm14, %v894_v40, %v898_v55  ;;  %v841_v17 = vrot.slane %v839_v50, 4  ;;  %v848_v24 = vshll.u32 %v790_v3, 16  ;;  %v1067_v4 = vrot.slane %v3411_v51, 5 }
  0xed   : > { %v3427_v53 = vpop.permute.xlu1 %1810  ;;  %1900 = vrot.lane.b32.xlu2 %v1887_v23, %s2819_s11  ;;  %v904_v61 = vrot.slane %v903_v14, 4  ;;  %v844_v47 = vrot.slane %v842_v18, 5  ;;  %v852_v0 = vshrl.u32 %v790_v3, 16  ;;  %v1929_v28 = vpack.c.b16 %v1921_v58, %v1920_v63 }
  0xee   : > { %v1066_v32 = vrot.slane %v1064_v10, 4  ;;  %v850_v34 = vrot.slane %v848_v24, 5  ;;  %v858_v57 = vshll.u32 %v804_v1, 16  ;;  %v1744_v38 = vunpack.c.l.b16 %v899_v5  ;;  %v3442_v44 = vpop.permute.xlu2 %1938 }
  0xef   : > { %v909_v36 = vsel %vm3076_vm14, %v904_v61, %v908_v16  ;;  %v845_v33 = vor.u32 %v844_v47, %v841_v17  ;;  %v854_v41 = vrot.slane %v852_v0, 4  ;;  %v2543_v26 = vrot.slane %v1007_v30, 9  ;;  %v3467_v17 = vld [vmem:[#allocation2 + $0x34] sm:$0xf] }
  0xf0   : > { %v1745_v43 = vunpack.c.l.b16 %v909_v36  ;;  %v860_v21 = vrot.slane %v858_v57, 5  ;;  %v1050_v39 = vrot.slane %v790_v3, 5  ;;  %v1053_v48 = vrot.slane %v804_v1, 5  ;;  %v1625_v3 = vld [vmem:[#allocation2 + $0x6c] sm:$0xe] }
  0xf1   : > { %v846_v45 = vrot.slane %v845_v33, 4  ;;  %v855_v46 = vor.u32 %v854_v41, %v850_v34  ;;  %v785_v51 = vsel %vm3045_vm8, 0, %v784_v35  ;;  %v2015_v52 = vpack.c.b16 %v3433_v11, %v3429_v7  ;;  %v1103_v11 = vld [vmem:[#allocation2 + $0x30] sm:$0xf] }
  0xf2   : > { %1992 = vrot.lane.b32.xlu1 %v2711_v19, %s2820_s12  ;;  %v1052_v22 = vrot.slane %v1050_v39, 4  ;;  %786 = vst [vmem:[#allocation2 + $0x74] sm:$0x1] %v785_v51  ;;  %v1595_v27 = vshrl.u32 %v1416_v25, 16  ;;  %v1065_v54 = vsel %vm3053_vm11, %v2545_v13, %v1064_v10  ;;  %v1068_v12 = vsel %vm3053_vm11, %v1066_v32, %v1067_v4  ;;  %v1623_v51 = vld [vmem:[#allocation2 + $0x54] sm:$0xe] }
  0xf3   : > { %1988 = vrot.lane.b32.xlu0 %v2709_v20, %s2820_s12  ;;  %v851_v60 = vsel %vm3076_vm14, %v846_v45, %v850_v34  ;;  %v856_v55 = vrot.slane %v855_v46, 4  ;;  %v1757_v59 = vpack.c.b16 %v1745_v43, %v1744_v38  ;;  %v1051_v62 = vsel %vm3053_vm11, %v2543_v26, %v1050_v39  ;;  %v3483_v46 = vld [vmem:[#allocation2 + $0x38] sm:$0x1] }
  0xf4   : > { %v1740_v15 = vunpack.c.l.b16 %v851_v60  ;;  %v1054_v63 = vsel %vm3053_vm11, %v1052_v22, %v1053_v48  ;;  %v1597_v2 = vrot.slane %v1595_v27, 4  ;;  %v1598_v49 = vshll.u32 %v1416_v25, 16 }
  0xf5   : > { %v3446_v29 = vpop.permute.xlu0 %1770  ;;  %v3450_v23 = vpop.permute.xlu1 %1814  ;;  %1944 = vrot.lane.b32.xlu2 %v1929_v28, %s2821_s13  ;;  %v861_v40 = vsel %vm3076_vm14, %v856_v55, %v860_v21  ;;  %v1784_v7 = vunpack.c.l.b16 %v1065_v54  ;;  %v1604_v10 = vshll.u32 %v1417_v56, 16  ;;  %v1608_v50 = vshrl.u32 %v1417_v56, 16 }
  0xf6   : > { %v1741_v58 = vunpack.c.l.b16 %v861_v40  ;;  %v1785_v14 = vunpack.c.l.b16 %v1068_v12  ;;  %v1780_v16 = vunpack.c.l.b16 %v1051_v62  ;;  %v1781_v1 = vunpack.c.l.b16 %v1054_v63  ;;  %v3474_v35 = vpop.permute.xlu2 %1990  ;;  %v2692_v40 = vld [vmem:[#allocation2 + $0x30] sm:$0xff] }
  0xf7   : > { %v1600_v18 = vrot.slane %v1598_v49, 5  ;;  %v1606_v20 = vrot.slane %v1604_v10, 5  ;;  %v1610_v5 = vrot.slane %v1608_v50, 4  ;;  %v2565_v13 = vrot.slane %v1625_v3, 9 }
  0xf8   : > { %v1755_v19 = vpack.c.b16 %v1741_v58, %v1740_v15  ;;  %v1701_v4 = vrot.slane %v1417_v56, 5  ;;  %v1194_v47 = vshrl.u32 %v1103_v11, 16  ;;  %v1197_v57 = vshll.u32 %v1103_v11, 16  ;;  %v1099_v56 = vld [vmem:[#allocation2 + $0x18] sm:$0xf]  ;;  %v2694_v58 = vld [vmem:[#allocation2 + $0x48] sm:$0xff] }
  0xf9   : > { %v1425_v24 = vld [vmem:[#allocation2 + $0x74] sm:$0x1]  ;;  %v1601_v61 = vor.u32 %v1600_v18, %v1597_v2  ;;  %v1611_v28 = vor.u32 %v1610_v5, %v1606_v20  ;;  %v1203_v41 = vshll.u32 %v3467_v17, 16  ;;  %v1797_v25 = vpack.c.b16 %v1785_v14, %v1784_v7 }
  0xfa   : > { %2028 = vrot.lane.b32.xlu1 %v2015_v52, %s2822_s15  ;;  %v1614_v32 = vshll.u32 %v1425_v24, 16  ;;  %v1704_v34 = vrot.slane %v1425_v24, 5  ;;  %v1702_v38 = vsel %vm3053_vm11, %v2565_v13, %v1701_v4  ;;  %v1703_v33 = vrot.slane %v1701_v4, 4  ;;  %v3504_v24 = vld [vmem:[#allocation2 + $0x20] sm:$0x1] }
  0xfb   : > { %1768 = vrot.lane.b32.xlu0 %v1757_v59, %s2818_s10  ;;  %v1602_v36 = vrot.slane %v1601_v61, 4  ;;  %v1795_v43 = vpack.c.b16 %v1781_v1, %v1780_v16  ;;  %v1612_v21 = vrot.slane %v1611_v28, 4  ;;  %vm2074_vm15 = vcmask 31744  }
  0xfc   : > { %v1616_v26 = vrot.slane %v1614_v32, 5  ;;  %v1705_v45 = vsel %vm3053_vm11, %v1703_v33, %v1704_v34  ;;  %v1196_v48 = vrot.slane %v1194_v47, 4  ;;  %vm2099_vm0 = vcmask 64512  }
  0xfd   : > { %v3469_v0 = vpop.permute.xlu0 %1774  ;;  %v3471_v30 = vpop.permute.xlu1 %1902  ;;  %1764 = vrot.lane.b32.xlu2 %v1755_v19, %s2818_s10  ;;  %v1607_v39 = vsel %vm3076_vm14, %v1602_v36, %v1606_v20  ;;  %v2048_v27 = vunpack.c.l.b16 %v1702_v38  ;;  %v1199_v12 = vrot.slane %v1197_v57, 5  ;;  %v1205_v60 = vrot.slane %v1203_v41, 5  ;;  %v3500_v20 = vld [vmem:[#allocation2 + $0x1c] sm:$0xf]  ;;  %v2222_v36 = vld [vmem:[%s3758_s3 + $0x10] sm:$0x3] }
  0xfe   : > { %v1617_v52 = vsel %vm3076_vm14, %v1612_v21, %v1616_v26  ;;  %v2008_v22 = vunpack.c.l.b16 %v1607_v39  ;;  %v1207_v55 = vshrl.u32 %v3467_v17, 16  ;;  %v2049_v59 = vunpack.c.l.b16 %v1705_v45  ;;  %v1316_v39 = vld [vmem:[#allocation2 + $0x30] sm:$0xe] }
  0xff   : > { %v2009_v54 = vunpack.c.l.b16 %v1617_v52  ;;  %v1213_v15 = vshll.u32 %v3483_v46, 16  ;;  %v2563_v62 = vrot.slane %v1623_v51, 9  ;;  %v1687_v63 = vrot.slane %v3385_v6, 5  ;;  %v1408_v52 = vld [vmem:[#allocation2 + $0x3c] sm:$0xf] }
 0x100   : > { %v1200_v49 = vor.u32 %v1199_v12, %v1196_v48  ;;  %v1209_v3 = vrot.slane %v1207_v55, 4  ;;  %v1690_v7 = vrot.slane %v3394_v42, 5  ;;  %vm2116_vm1 = vcmask 97280   ;;  %v2697_v42 = vld [vmem:[#allocation2 + $0x18] sm:$0xff] }
 0x101   : > { %v2017_v2 = vpack.c.b16 %v2009_v54, %v2008_v22  ;;  %v1688_v11 = vsel %vm3053_vm11, %v2563_v62, %v1687_v63  ;;  %v1689_v14 = vrot.slane %v1687_v63, 4  ;;  %v1146_v16 = vshrl.u32 %v1099_v56, 16 }
 0x102   : > { %1808 = vrot.lane.b32.xlu1 %v1797_v25, %s2816_s18  ;;  %v1201_v6 = vrot.slane %v1200_v49, 4  ;;  %v1210_v1 = vor.u32 %v1209_v3, %v1205_v60  ;;  %v1215_v18 = vrot.slane %v1213_v15, 5  ;;  %v2044_v19 = vunpack.c.l.b16 %v1688_v11 }
 0x103   : > { %1804 = vrot.lane.b32.xlu0 %v1795_v43, %s2816_s18  ;;  %v2057_v5 = vpack.c.b16 %v2049_v59, %v2048_v27  ;;  %v1691_v13 = vsel %vm3053_vm11, %v1689_v14, %v1690_v7  ;;  %v1148_v61 = vrot.slane %v1146_v16, 4  ;;  %v1149_v4 = vshll.u32 %v1099_v56, 16  ;;  %v3535_v7 = vld [vmem:[#allocation2 + $0x40] sm:$0xf]  ;;  %v2713_v14 = vld [vmem:[%s3758_s3 + $0x8] sm:$0xff] }
 0x104   : > { %v2089_v47 = vsel %vm2074_vm15, %v2692_v40, %v3446_v29  ;;  %vm2133_vm2 = vcmask 130048   ;;  %v1206_v32 = vsel %vm3076_vm14, %v1201_v6, %v1205_v60  ;;  %v1211_v34 = vrot.slane %v1210_v1, 4  ;;  %v3546_v16 = vld [vmem:[#allocation2 + $0x44] sm:$0x1] }
 0x105   : > { %v3493_v10 = vpop.permute.xlu0 %1898  ;;  %v3495_v50 = vpop.permute.xlu1 %1986  ;;  %2032 = vrot.lane.b32.xlu2 %v2017_v2, %s2822_s15  ;;  %v2045_v57 = vunpack.c.l.b16 %v1691_v13  ;;  %v2095_v38 = vsel %vm2074_vm15, %v2694_v58, %v3469_v0  ;;  %v1872_v33 = vunpack.c.l.b16 %v1206_v32  ;;  %v1151_v41 = vrot.slane %v1149_v4, 5 }
 0x106   : > { %v1155_v25 = vshll.u32 %v3500_v20, 16  ;;  %v1216_v29 = vsel %vm3076_vm14, %v1211_v34, %v1215_v18  ;;  %v1159_v21 = vshrl.u32 %v3500_v20, 16  ;;  %v1165_v26 = vshll.u32 %v3504_v24, 16  ;;  %v1404_v34 = vld [vmem:[#allocation2 + $0x24] sm:$0xf] }
 0x107   : > { %v3508_v28 = vpop.permute.xlu2 %2026  ;;  %v2055_v43 = vpack.c.b16 %v2045_v57, %v2044_v19  ;;  %v1873_v45 = vunpack.c.l.b16 %v1216_v29  ;;  %v1152_v48 = vor.u32 %v1151_v41, %v1148_v61  ;;  %v2236_v51 = vunpack.c.l.b16 %v2222_v36  ;;  %v2699_v19 = vld [vmem:[#allocation2 + $0x30] sm:$0xff]  ;;  %v3560_v57 = vld [vmem:[#allocation2 + $0x28] sm:$0xf] }
 0x108   : > { %v1157_v0 = vrot.slane %v1155_v25, 5  ;;  %v2109_v22 = vsel %vm2099_vm0, %v2089_v47, %v3427_v53  ;;  %v2113_v27 = vsel %vm2099_vm0, %v2095_v38, %v3450_v23  ;;  %v1161_v54 = vrot.slane %v1159_v21, 4  ;;  %v3568_v25 = vld [vmem:[#allocation2 + $0x2c] sm:$0x1] }
 0x109   : > { %vm2259_vm3 = vcmask 1041408   ;;  %v1153_v60 = vrot.slane %v1152_v48, 4  ;;  %v2239_v55 = vpack.c.b16 %v2236_v51, %v2236_v51  ;;  %v2553_v56 = vrot.slane %v1316_v39, 9  ;;  %v2705_v51 = vld [vmem:[#allocation2 + $0x24] sm:$0xff] }
 0x10a   : > { %1852 = vrot.lane.b32.xlu1 %v2697_v42, %s2817_s9  ;;  %v1368_v59 = vrot.slane %v3467_v17, 5  ;;  %v1162_v15 = vor.u32 %v1161_v54, %v1157_v0  ;;  %v1167_v62 = vrot.slane %v1165_v26, 5  ;;  %v1371_v63 = vrot.slane %v3483_v46, 5 }
 0x10b   : > { %2072 = vrot.lane.b32.xlu0 %v2057_v5, %s2823_s16  ;;  %v1499_v40 = vshrl.u32 %v1408_v52, 16  ;;  %v1885_v2 = vpack.c.b16 %v1873_v45, %v1872_v33  ;;  %v1158_v23 = vsel %vm3076_vm14, %v1153_v60, %v1157_v0  ;;  %v2261_v49 = vsel %vm2259_vm3, %v2239_v55, 0 }
 0x10c   : > { %v1370_v3 = vrot.slane %v1368_v59, 4  ;;  %v2130_v17 = vsel %vm2116_vm1, %v2113_v27, %v3417_v31  ;;  %v2126_v58 = vsel %vm2116_vm1, %v2109_v22, %v3390_v9  ;;  %vm2150_vm4 = vcmask 162816   ;;  %2716 = vmatpush.bf16.msra.mxu3 %v2261_v49  ;;  %2715 = vmatpush.bf16.msra.mxu2 %v2261_v49 }
 0x10d   : > { %v1943_v12 = vpop.permute.xlu0 %1942  ;;  %2068 = vrot.lane.b32.xlu2 %v2055_v43, %s2823_s16  ;;  %v1163_v46 = vrot.slane %v1162_v15, 4  ;;  %vm2167_vm5 = vcmask 195584   ;;  %v1868_v6 = vunpack.c.l.b16 %v1158_v23  ;;  %v1369_v31 = vsel %vm3053_vm11, %v2553_v56, %v1368_v59  ;;  %2714 = vmatpush.bf16.msra.mxu1 %v2261_v49 }
 0x10e   : > { %v1501_v1 = vrot.slane %v1499_v40, 4  ;;  %v1502_v18 = vshll.u32 %v1408_v52, 16  ;;  %2268 = vmatpush.bf16.msra.mxu0 %v2261_v49  ;;  %v1372_v42 = vsel %vm3053_vm11, %v1370_v3, %v1371_v63  ;;  %v1508_v5 = vshll.u32 %v3535_v7, 16 }
 0x10f   : > { %v3531_v53 = vpop.permute.xlu1 %1766  ;;  %v3541_v11 = vpop.permute.xlu2 %1806  ;;  %v1168_v9 = vsel %vm3076_vm14, %v1163_v46, %v1167_v62  ;;  %v1512_v13 = vshrl.u32 %v3535_v7, 16  ;;  %v2147_v61 = vsel %vm2133_vm2, %v2130_v17, %v3471_v30  ;;  %v1518_v32 = vshll.u32 %v3546_v16, 16  ;;  %v2712_v30 = vld [vmem:[%s3758_s3] sm:$0xff] }
 0x110   : > { %v1869_v4 = vunpack.c.l.b16 %v1168_v9  ;;  %v1504_v47 = vrot.slane %v1502_v18, 5  ;;  %v2143_v36 = vsel %vm2133_vm2, %v2126_v58, %v3493_v10  ;;  %v2164_v38 = vsel %vm2150_vm4, %v2147_v61, %v1943_v12  ;;  %2719 = vmatpush.bf16.msra.mxu3 %v2713_v14  ;;  %2718 = vmatpush.bf16.msra.mxu2 %v2713_v14  ;;  %v1621_v58 = vld [vmem:[#allocation2 + $0x3c] sm:$0xe] }
 0x111   : > { %v1510_v33 = vrot.slane %v1508_v5, 5  ;;  %v1514_v41 = vrot.slane %v1512_v13, 4  ;;  %v1912_v21 = vunpack.c.l.b16 %v1369_v31  ;;  %v1913_v26 = vunpack.c.l.b16 %v1372_v42  ;;  %2717 = vmatpush.bf16.msra.mxu1 %v2713_v14 }
 0x112   : > { %1896 = vrot.lane.b32.xlu1 %v1885_v2, %s2819_s11  ;;  %v1883_v29 = vpack.c.b16 %v1869_v4, %v1868_v6  ;;  %v1505_v39 = vor.u32 %v1504_v47, %v1501_v1  ;;  %2269 = vmatpush.bf16.msra.mxu0 %v2713_v14  ;;  %v1520_v45 = vrot.slane %v1518_v32, 5  ;;  %v1451_v48 = vshrl.u32 %v1404_v34, 16  ;;  %v1314_v2 = vld [vmem:[#allocation2 + $0x18] sm:$0xe] }
 0x113   : > { %v1515_v10 = vor.u32 %v1514_v41, %v1510_v33  ;;  %v1454_v0 = vshll.u32 %v1404_v34, 16  ;;  %v1460_v27 = vshll.u32 %v3560_v57, 16  ;;  %v1464_v54 = vshrl.u32 %v3560_v57, 16 }
 0x114   : > { %1892 = vrot.lane.b32.xlu0 %v1883_v29, %s2819_s11  ;;  %v1506_v22 = vrot.slane %v1505_v39, 4  ;;  %v1470_v12 = vshll.u32 %v3568_v25, 16  ;;  %vm2184_vm6 = vcmask 228352   ;;  %2722 = vmatpush.bf16.msra.mxu3 %v2712_v30  ;;  %v1453_v56 = vrot.slane %v1451_v48, 4 }
 0x115   : > { %v3570_v43 = vpop.permute.xlu0 %1762  ;;  %1856 = vrot.lane.b32.xlu2 %v2699_v19, %s2817_s9  ;;  %v1516_v55 = vrot.slane %v1515_v10, 4  ;;  %v1456_v59 = vrot.slane %v1454_v0, 5  ;;  %2721 = vmatpush.bf16.msra.mxu2 %v2712_v30  ;;  %v2160_v15 = vsel %vm2150_vm4, %v2143_v36, %v3442_v44  ;;  %v1462_v63 = vrot.slane %v1460_v27, 5 }
 0x116   : > { %v1511_v62 = vsel %vm3076_vm14, %v1506_v22, %v1510_v33  ;;  %v1466_v40 = vrot.slane %v1464_v54, 4  ;;  %2720 = vmatpush.bf16.msra.mxu1 %v2712_v30  ;;  %2270 = vmatpush.bf16.msra.mxu0 %v2712_v30  ;;  %v1925_v23 = vpack.c.b16 %v1913_v26, %v1912_v21  ;;  %v2181_v3 = vsel %vm2167_vm5, %v2164_v38, %v3474_v35 }
 0x117   : > { %v3574_v52 = vpop.permute.xlu1 %1802  ;;  %v3579_v60 = vpop.permute.xlu2 %1850  ;;  %v1521_v49 = vsel %vm3076_vm14, %v1516_v55, %v1520_v45  ;;  %v1457_v17 = vor.u32 %v1456_v59, %v1453_v56  ;;  %v2000_v44 = vunpack.c.l.b16 %v1511_v62  ;;  %v1472_v6 = vrot.slane %v1470_v12, 5  ;;  %v2707_v59 = vld [vmem:[#allocation2 + $0x3c] sm:$0xff] }
 0x118   : > { %v2001_v46 = vunpack.c.l.b16 %v1521_v49  ;;  %v1467_v14 = vor.u32 %v1466_v40, %v1462_v63  ;;  %v1673_v1 = vrot.slane %v3535_v7, 5  ;;  %v2551_v18 = vrot.slane %v1314_v2, 9  ;;  %v2690_v49 = vld [vmem:[#allocation2 + $0x18] sm:$0xff] }
 0x119   : > { %v1458_v31 = vrot.slane %v1457_v17, 4  ;;  %v1354_v9 = vrot.slane %v3500_v20, 5  ;;  %vm2201_vm7 = vcmask 261120   ;;  %vm2242_vm8 = vcmask 293888  }
 0x11a   : > { %1980 = vrot.lane.b32.xlu1 %v2705_v51, %s2820_s12  ;;  %v1468_v42 = vrot.slane %v1467_v14, 4  ;;  %v2561_v5 = vrot.slane %v1621_v58, 9  ;;  %v1676_v61 = vrot.slane %v3546_v16, 5  ;;  %v2013_v7 = vpack.c.b16 %v2001_v46, %v2000_v44  ;;  %v1619_v51 = vld [vmem:[#allocation2 + $0x24] sm:$0xe] }
 0x11b   : > { %v1463_v13 = vsel %vm3076_vm14, %v1458_v31, %v1462_v63  ;;  %v1355_v4 = vsel %vm3053_vm11, %v2551_v18, %v1354_v9  ;;  %v1356_v34 = vrot.slane %v1354_v9, 4  ;;  %v1675_v41 = vrot.slane %v1673_v1, 4 }
 0x11c   : > { %1936 = vrot.lane.b32.xlu0 %v1925_v23, %s2821_s13  ;;  %v1473_v20 = vsel %vm3076_vm14, %v1468_v42, %v1472_v6  ;;  %v1996_v32 = vunpack.c.l.b16 %v1463_v13  ;;  %v1357_v30 = vrot.slane %v3504_v24, 5  ;;  %v1908_v16 = vunpack.c.l.b16 %v1355_v4 }
 0x11d   : > { %v2031_v19 = vpop.permute.xlu0 %2030  ;;  %v1997_v33 = vunpack.c.l.b16 %v1473_v20  ;;  %v2177_v29 = vsel %vm2167_vm5, %v2160_v15, %v3495_v50  ;;  %v1674_v39 = vsel %vm3053_vm11, %v2561_v5, %v1673_v1  ;;  %v1677_v10 = vsel %vm3053_vm11, %v1675_v41, %v1676_v61  ;;  %v2693_v41 = vld [vmem:[#allocation2 + $0x3c] sm:$0xff] }
 0x11e   : > { %v2198_v35 = vsel %vm2184_vm6, %v2181_v3, %v2031_v19  ;;  %v1358_v21 = vsel %vm3053_vm11, %v1356_v34, %v1357_v30  ;;  %v2194_v24 = vsel %vm2184_vm6, %v2177_v29, %v3508_v28  ;;  %v1659_v50 = vrot.slane %v3560_v57, 5  ;;  %v2688_v3 = vld [vmem:[#allocation2] sm:$0xff] }
 0x11f   : > { %v2071_v47 = vpop.permute.xlu1 %2070  ;;  %v1895_v36 = vpop.permute.xlu2 %1894  ;;  %v2011_v37 = vpack.c.b16 %v1997_v33, %v1996_v32  ;;  %v1909_v26 = vunpack.c.l.b16 %v1358_v21  ;;  %v2040_v22 = vunpack.c.l.b16 %v1674_v39  ;;  %v2041_v27 = vunpack.c.l.b16 %v1677_v10 }
 0x120   : > { %v2215_v38 = vsel %vm2201_vm7, %v2198_v35, %v2071_v47  ;;  %v2559_v12 = vrot.slane %v1619_v51, 9  ;;  %v1661_v55 = vrot.slane %v1659_v50, 4  ;;  %v1662_v28 = vrot.slane %v3568_v25, 5 }
 0x121   : > { %2676 = vmatmul.msk.bf16.vlgmr.msra.gmra.mxu3 %vm2242_vm8, %v2215_v38  ;;  %v1923_v48 = vpack.c.b16 %v1909_v26, %v1908_v16  ;;  %v2053_v56 = vpack.c.b16 %v2041_v27, %v2040_v22  ;;  %v2083_v17 = vsel %vm2074_vm15, %v2690_v49, %v3531_v53  ;;  %v2077_v46 = vsel %vm2074_vm15, %v2688_v3, %v3570_v43 }
 0x122   : > { %2024 = vrot.lane.b32.xlu1 %v2013_v7, %s2822_s15  ;;  %v1660_v62 = vsel %vm3053_vm11, %v2559_v12, %v1659_v50  ;;  %v1663_v63 = vsel %vm3053_vm11, %v1661_v55, %v1662_v28  ;;  %v2105_v8 = vsel %vm2099_vm0, %v2083_v17, %v3541_v11  ;;  %v2101_v31 = vsel %vm2099_vm0, %v2077_v46, %v3574_v52  ;;  %v2689_v17 = vld [vmem:[#allocation2 + $0xc] sm:$0xff] }
 0x123   : > { %1932 = vrot.lane.b32.xlu2 %v1923_v48, %s2821_s13  ;;  %v2036_v2 = vunpack.c.l.b16 %v1660_v62  ;;  %v2037_v23 = vunpack.c.l.b16 %v1663_v63  ;;  %v2118_v53 = vsel %vm2116_vm1, %v2101_v31, %v3579_v60  ;;  %vm2344_vm9 = vcmask 60416  }
 0x124   : > { %2020 = vrot.lane.b32.xlu0 %v2011_v37, %s2822_s15 }
 0x125   : > { %v2067_v45 = vpop.permute.xlu0 %2066  ;;  %v2051_v25 = vpack.c.b16 %v2037_v23, %v2036_v2 }
 0x126   : > { %v2211_v0 = vsel %vm2201_vm7, %v2194_v24, %v2067_v45  ;;  %v2695_v45 = vld [vmem:[#allocation2 + $0x54] sm:$0xff] }
 0x127   : > { %2674 = vmatmul.msk.bf16.vlgmr.msra.gmra.mxu2 %vm2242_vm8, %v2211_v0  ;;  %v1979_v54 = vpop.permute.xlu2 %1978 }
 0x12b   : > { %1984 = vrot.lane.b32.xlu2 %v2707_v59, %s2820_s12 }
 0x12c   : > { %v1891_v15 = vpop.permute.xlu1 %1890  ;;  %2064 = vrot.lane.b32.xlu0 %v2053_v56, %s2823_s16 }
 0x12d   : > { %v1855_v57 = vpop.permute.xlu0 %1854  ;;  %v2135_v43 = vsel %vm2133_vm2, %v2118_v53, %v1891_v15 }
 0x12e   : > { %v2122_v6 = vsel %vm2116_vm1, %v2105_v8, %v1855_v57  ;;  %v2691_v8 = vld [vmem:[#allocation2 + $0x24] sm:$0xff] }
 0x12f   : > { %v2023_v40 = vpop.permute.xlu2 %2022  ;;  %v2139_v1 = vsel %vm2133_vm2, %v2122_v6, %v1895_v36 }
 0x133   : > { %2060 = vrot.lane.b32.xlu2 %v2051_v25, %s2823_s16 }
 0x134   : > { %v1935_v58 = vpop.permute.xlu1 %1934 }
 0x135   : > { %v1931_v44 = vpop.permute.xlu0 %1930  ;;  %v2156_v19 = vsel %vm2150_vm4, %v2139_v1, %v1935_v58 }
 0x136   : > { %v2152_v11 = vsel %vm2150_vm4, %v2135_v43, %v1931_v44 }
 0x137   : > { %v1773_v14 = vpop.permute.xlu2 %1772  ;;  %v2169_v35 = vsel %vm2167_vm5, %v2152_v11, %v1979_v54 }
 0x138   : > { %v2092_v29 = vsel %vm2074_vm15, %v2693_v41, %v1773_v14 }
 0x13c   : > { %v2019_v18 = vpop.permute.xlu1 %2018 }
 0x13d   : > { %v1983_v9 = vpop.permute.xlu0 %1982  ;;  %v2186_v13 = vsel %vm2184_vm6, %v2169_v35, %v2019_v18 }
 0x13e   : > { %v2173_v42 = vsel %vm2167_vm5, %v2156_v19, %v1983_v9 }
 0x13f   : > { %v1817_v5 = vpop.permute.xlu2 %1816  ;;  %v2190_v52 = vsel %vm2184_vm6, %v2173_v42, %v2023_v40 }
 0x144   : > { %v2063_v61 = vpop.permute.xlu1 %2062 }
 0x145   : > { %v2059_v4 = vpop.permute.xlu0 %2058  ;;  %v2207_v60 = vsel %vm2201_vm7, %v2190_v52, %v2063_v61 }
 0x146   : > { %v2203_v7 = vsel %vm2201_vm7, %v2186_v13, %v2059_v4  ;;  %2672 = vmatmul.msk.bf16.vlgmr.msra.gmra.mxu1 %vm2242_vm8, %v2207_v60 }
 0x147   : > { %2670 = vmatmul.msk.bf16.vlgmr.msra.gmra.mxu0 %vm2242_vm8, %v2203_v7  ;;  %v1901_v47 = vpop.permute.xlu2 %1900 }
 0x14c   : > { %v1813_v20 = vpop.permute.xlu1 %1812 }
 0x14d   : > { %v1777_v32 = vpop.permute.xlu0 %1776  ;;  %v2111_v37 = vsel %vm2099_vm0, %v2092_v29, %v1813_v20  ;;  %v3688_v20 = vld [vmem:[%s3759_s4] ss:$0 sm:$0xff] }
 0x14e   : > { %v2098_v51 = vsel %vm2074_vm15, %v2695_v45, %v1777_v32 }
 0x14f   : > { %v1945_v34 = vpop.permute.xlu2 %1944  ;;  %v2115_v55 = vsel %vm2099_vm0, %v2098_v51, %v1817_v5 }
 0x154   : > { %v1865_v36 = vpop.permute.xlu1 %1864 }
 0x155   : > { %v1861_v38 = vpop.permute.xlu0 %1860  ;;  %v2132_v28 = vsel %vm2116_vm1, %v2115_v55, %v1865_v36 }
 0x156   : > { %v2128_v26 = vsel %vm2116_vm1, %v2111_v37, %v1861_v38 }
 0x157   : > { %v1765_v33 = vpop.permute.xlu2 %1764  ;;  %v2145_v24 = vsel %vm2133_vm2, %v2128_v26, %v1901_v47 }
 0x158   : > { %v2080_v44 = vsel %vm2074_vm15, %v2689_v17, %v1765_v33 }
 0x15c   : > { %v1941_v30 = vpop.permute.xlu1 %1940 }
 0x15d   : > { %v1905_v16 = vpop.permute.xlu0 %1904  ;;  %v2162_v48 = vsel %vm2150_vm4, %v2145_v24, %v1941_v30 }
 0x15e   : > { %v2149_v56 = vsel %vm2133_vm2, %v2132_v28, %v1905_v16 }
 0x15f   : > { %v2033_v21 = vpop.permute.xlu2 %2032  ;;  %v2166_v57 = vsel %vm2150_vm4, %v2149_v56, %v1945_v34 }
 0x164   : > { %v1993_v39 = vpop.permute.xlu1 %1992 }
 0x165   : > { %v1989_v10 = vpop.permute.xlu0 %1988  ;;  %v2183_v62 = vsel %vm2167_vm5, %v2166_v57, %v1993_v39 }
 0x166   : > { %v2179_v50 = vsel %vm2167_vm5, %v2162_v48, %v1989_v10  ;;  %v2200_v40 = vsel %vm2184_vm6, %v2183_v62, %v2033_v21 }
 0x167   : > { %v2069_v0 = vpop.permute.xlu2 %2068 }
 0x16c   : > { %v2029_v22 = vpop.permute.xlu1 %2028 }
 0x16d   : > { %v1769_v27 = vpop.permute.xlu0 %1768  ;;  %v2196_v54 = vsel %vm2184_vm6, %v2179_v50, %v2029_v22 }
 0x16e   : > { %v2213_v12 = vsel %vm2201_vm7, %v2196_v54, %v2069_v0  ;;  %v2086_v1 = vsel %vm2074_vm15, %v2691_v8, %v1769_v27 }
 0x16f   : > { %2675 = vmatmul.msk.bf16.gmra.mxu2 %vm2242_vm8, %v2213_v12  ;;  %v1857_v63 = vpop.permute.xlu2 %1856 }
 0x174   : > { %v1809_v15 = vpop.permute.xlu1 %1808 }
 0x175   : > { %v1805_v59 = vpop.permute.xlu0 %1804  ;;  %v2107_v9 = vsel %vm2099_vm0, %v2086_v1, %v1809_v15 }
 0x176   : > { %v2103_v14 = vsel %vm2099_vm0, %v2080_v44, %v1805_v59  ;;  %v2124_v11 = vsel %vm2116_vm1, %v2107_v9, %v1857_v63 }
 0x17c   : > { %v1853_v49 = vpop.permute.xlu1 %1852 }
 0x17d   : > { %v2073_v2 = vpop.permute.xlu0 %2072  ;;  %v1933_v3 = vpop.permute.xlu2 %1932  ;;  %v2120_v31 = vsel %vm2116_vm1, %v2103_v14, %v1853_v49 }
 0x17e   : > { %v2217_v23 = vsel %vm2201_vm7, %v2200_v40, %v2073_v2 }
 0x17f   : > { %2677 = vmatmul.msk.bf16.gmra.mxu3 %vm2242_vm8, %v2217_v23 }
 0x184   : > { %v1897_v58 = vpop.permute.xlu1 %1896 }
 0x185   : > { %v1985_v46 = vpop.permute.xlu2 %1984  ;;  %v2141_v35 = vsel %vm2133_vm2, %v2124_v11, %v1897_v58 }
 0x186   : > { %v1893_v25 = vpop.permute.xlu0 %1892 }
 0x187   : > { %v2137_v53 = vsel %vm2133_vm2, %v2120_v31, %v1893_v25 }
 0x188   : > { %v2154_v43 = vsel %vm2150_vm4, %v2137_v53, %v1933_v3 }
 0x18c   : > { %v1981_v18 = vpop.permute.xlu1 %1980 }
 0x18d   : > { %v2061_v19 = vpop.permute.xlu2 %2060  ;;  %v2171_v42 = vsel %vm2167_vm5, %v2154_v43, %v1981_v18 }
 0x18e   : > { %v1937_v6 = vpop.permute.xlu0 %1936 }
 0x18f   : > { %v2158_v13 = vsel %vm2150_vm4, %v2141_v35, %v1937_v6 }
 0x190   : > { %v2175_v4 = vsel %vm2167_vm5, %v2158_v13, %v1985_v46 }
 0x194   : > { %v2025_v60 = vpop.permute.xlu1 %2024 }
 0x195   : > { %v2192_v7 = vsel %vm2184_vm6, %v2175_v4, %v2025_v60 }
 0x196   : > { %v2021_v5 = vpop.permute.xlu0 %2020 }
 0x197   : > { %v2188_v52 = vsel %vm2184_vm6, %v2171_v42, %v2021_v5 }
 0x198   : > { %v2205_v61 = vsel %vm2201_vm7, %v2188_v52, %v2061_v19 }
 0x199   : > { %2671 = vmatmul.msk.bf16.gmra.mxu0 %vm2242_vm8, %v2205_v61 }
 0x19e   : > { %v2065_v47 = vpop.permute.xlu0 %2064 }
 0x19f   : > { %v2209_v32 = vsel %vm2201_vm7, %v2192_v7, %v2065_v47 }
 0x1a0   : > { %2673 = vmatmul.msk.bf16.gmra.mxu1 %vm2242_vm8, %v2209_v32 }
 0x1a4   : > { %v2302_v34 = vpop.f32.mrf.mxu3 }
 0x1a5   : > { %v2303_v36 = vadd.f32 %v3688_v20, %v2302_v34 }
 0x1a7   : > { %v2324_v38 = vmax.f32 %v2303_v36, 0.0 }
 0x1a9   : > { %v2340_v33 = vpack.c.bf16 %v2324_v38, %v2324_v38 }
 0x1aa   : > { %v2292_v41 = vpop.f32.mrf.mxu2 }
 0x1ab   : > { %2357 = vst.msk [vmem:[%s2902_s14 + $0x30] sm:$0xf] %vm2344_vm9, %v2340_v33  ;;  %v2293_v30 = vadd.f32 %v3688_v20, %v2292_v41 }
 0x1ac   : > { %v2304_v16 = vpop.f32.mrf.mxu3 }
 0x1ad   : > { %v2320_v29 = vmax.f32 %v2293_v30, 0.0  ;;  %v2305_v21 = vadd.f32 %v3688_v20, %v2304_v16 }
 0x1af   : > { %v2336_v37 = vpack.c.bf16 %v2320_v29, %v2320_v29  ;;  %v2325_v26 = vmax.f32 %v2305_v21, 0.0 }
 0x1b1   : > { %2353 = vst.msk [vmem:[%s2902_s14 + $0x20] sm:$0xf] %vm2344_vm9, %v2336_v37  ;;  %v2341_v39 = vpack.c.bf16 %v2325_v26, %v2325_v26 }
 0x1b2   : > { %v2294_v10 = vpop.f32.mrf.mxu2 }
 0x1b3   : > { %2358 = vst.msk [vmem:[%s2902_s14 + $0x34] sm:$0xf] %vm2344_vm9, %v2341_v39  ;;  %v2295_v24 = vadd.f32 %v3688_v20, %v2294_v10 }
 0x1b5   : > { %v2321_v45 = vmax.f32 %v2295_v24, 0.0 }
 0x1b7   : > { %v2337_v48 = vpack.c.bf16 %v2321_v45, %v2321_v45 }
 0x1b9   : > { %2354 = vst.msk [vmem:[%s2902_s14 + $0x24] sm:$0xf] %vm2344_vm9, %v2337_v48 }
 0x1c3   : > { %v2282_v50 = vpop.f32.mrf.mxu1 }
 0x1c4   : > { %v2272_v0 = vpop.f32.mrf.mxu0  ;;  %v2283_v51 = vadd.f32 %v3688_v20, %v2282_v50 }
 0x1c5   : > { %v2273_v22 = vadd.f32 %v3688_v20, %v2272_v0 }
 0x1c6   : > { %v2316_v27 = vmax.f32 %v2283_v51, 0.0 }
 0x1c7   : > { %v2312_v54 = vmax.f32 %v2273_v22, 0.0 }
 0x1c8   : > { %v2332_v12 = vpack.c.bf16 %v2316_v27, %v2316_v27 }
 0x1c9   : > { %v2328_v55 = vpack.c.bf16 %v2312_v54, %v2312_v54 }
 0x1ca   : > { %2349 = vst.msk [vmem:[%s2902_s14 + $0x10] sm:$0xf] %vm2344_vm9, %v2332_v12 }
 0x1cb   : > { %2345 = vst.msk [vmem:[%s2902_s14] sm:$0xf] %vm2344_vm9, %v2328_v55  ;;  %v2284_v28 = vpop.f32.mrf.mxu1 }
 0x1cc   : > { %v2274_v56 = vpop.f32.mrf.mxu0  ;;  %v2285_v59 = vadd.f32 %v3688_v20, %v2284_v28 }
 0x1cd   : > { %v2275_v15 = vadd.f32 %v3688_v20, %v2274_v56 }
 0x1ce   : > { %v2317_v57 = vmax.f32 %v2285_v59, 0.0 }
 0x1cf   : > { %v2313_v62 = vmax.f32 %v2275_v15, 0.0 }
 0x1d0   : > { %v2333_v63 = vpack.c.bf16 %v2317_v57, %v2317_v57 }
 0x1d1   : > { %v2329_v40 = vpack.c.bf16 %v2313_v62, %v2313_v62 }
 0x1d2   : > { %2350 = vst.msk [vmem:[%s2902_s14 + $0x14] sm:$0xf] %vm2344_vm9, %v2333_v63 }
 0x1d3   : > { %2346 = vst.msk [vmem:[%s2902_s14 + $0x4] sm:$0xf] %vm2344_vm9, %v2329_v40 }
 0x1f2   : > { %v2297_v2 = vpop.f32.mrf.mxu2 }
 0x1f3   : > { %v2298_v23 = vadd.f32 %v3688_v20, %v2297_v2 }
 0x1f5   : > { %v2322_v49 = vmax.f32 %v2298_v23, 0.0 }
 0x1f7   : > { %v2338_v3 = vpack.c.bf16 %v2322_v49, %v2322_v49 }
 0x1f9   : > { %2355 = vst.msk [vmem:[%s2902_s14 + $0x28] sm:$0xf] %vm2344_vm9, %v2338_v3 }
 0x1fa   : > { %v2299_v25 = vpop.f32.mrf.mxu2 }
 0x1fb   : > { %v2300_v17 = vadd.f32 %v3688_v20, %v2299_v25 }
 0x1fd   : > { %v2323_v58 = vmax.f32 %v2300_v17, 0.0 }
 0x1ff   : > { %v2339_v44 = vpack.c.bf16 %v2323_v58, %v2323_v58 }
 0x201   : > { %2356 = vst.msk [vmem:[%s2902_s14 + $0x2c] sm:$0xf] %vm2344_vm9, %v2339_v44 }
 0x202   : > { %v2307_v46 = vpop.f32.mrf.mxu3 }
 0x203   : > { %v2308_v8 = vadd.f32 %v3688_v20, %v2307_v46 }
 0x205   : > { %v2326_v14 = vmax.f32 %v2308_v8, 0.0 }
 0x207   : > { %v2342_v6 = vpack.c.bf16 %v2326_v14, %v2326_v14 }
 0x209   : > { %2359 = vst.msk [vmem:[%s2902_s14 + $0x38] sm:$0xf] %vm2344_vm9, %v2342_v6 }
 0x20a   : > { %v2309_v31 = vpop.f32.mrf.mxu3 }
 0x20b   : > { %v2310_v1 = vadd.f32 %v3688_v20, %v2309_v31 }
 0x20d   : > { %v2327_v53 = vmax.f32 %v2310_v1, 0.0 }
 0x20f   : > { %v2343_v18 = vpack.c.bf16 %v2327_v53, %v2327_v53 }
 0x211   : > { %2360 = vst.msk [vmem:[%s2902_s14 + $0x3c] sm:$0xf] %vm2344_vm9, %v2343_v18 }
 0x216   : > { %v2277_v9 = vpop.f32.mrf.mxu0 }
 0x217   : > { %v2278_v43 = vadd.f32 %v3688_v20, %v2277_v9 }
 0x219   : > { %v2314_v19 = vmax.f32 %v2278_v43, 0.0 }
 0x21b   : > { %v2330_v11 = vpack.c.bf16 %v2314_v19, %v2314_v19 }
 0x21d   : > { %2347 = vst.msk [vmem:[%s2902_s14 + $0x8] sm:$0xf] %vm2344_vm9, %v2330_v11  ;;  %v2287_v42 = vpop.f32.mrf.mxu1 }
 0x21e   : > { %v2288_v5 = vadd.f32 %v3688_v20, %v2287_v42  ;;  %v2279_v35 = vpop.f32.mrf.mxu0 }
 0x21f   : > { %v2280_v52 = vadd.f32 %v3688_v20, %v2279_v35 }
 0x220   : > { %v2318_v13 = vmax.f32 %v2288_v5, 0.0 }
 0x221   : > { %v2315_v61 = vmax.f32 %v2280_v52, 0.0 }
 0x222   : > { %v2334_v4 = vpack.c.bf16 %v2318_v13, %v2318_v13 }
 0x223   : > { %v2331_v60 = vpack.c.bf16 %v2315_v61, %v2315_v61 }
 0x224   : > { %2351 = vst.msk [vmem:[%s2902_s14 + $0x18] sm:$0xf] %vm2344_vm9, %v2334_v4 }
 0x225   : > { %2348 = vst.msk [vmem:[%s2902_s14 + $0xc] sm:$0xf] %vm2344_vm9, %v2331_v60  ;;  %v2289_v7 = vpop.f32.mrf.mxu1 }
 0x226   : > { %v2290_v47 = vadd.f32 %v3688_v20, %v2289_v7 }
 0x228   : > { %v2319_v32 = vmax.f32 %v2290_v47, 0.0 }
 0x22a   : > { %v2335_v34 = vpack.c.bf16 %v2319_v32, %v2319_v32 }
 0x22c   : > { %2352 = vst.msk [vmem:[%s2902_s14 + $0x1c] sm:$0xf] %vm2344_vm9, %v2335_v34 }
 0x22d PF: > { %s15_s22 = sadd.s32 1, %s2812_s22   ;;  %s3774_s18 = smov %s2804_s20 }
 0x22e   : > { %p12_p0 = scmp.ge.s32.totalorder %s15_s22, 6   ;;  %s3775_s19 = smov %s2808_s21 }
 0x22f   : > { %s3776_s20 = smov %s3779_s23  ;;  %s3777_s21 = smov %s3783_s24 }
 0x230   :  { %14 = sbr.rel (!%p12_p0) target bundleno = 3 (0x3), region = 96 }

</bundles_post_ra>
